<compile_context>
chip_gen: v7x
topology: tpu7x:2x2x1
jax: 0.10.0
libtpu: 0.0.40
codegen_flags: <defaults>
</compile_context>

<pallas_src>
import functools
import math

import jax
import jax.numpy as jnp
from jax import lax
from jax.experimental import pallas as pl
from jax.experimental.pallas import tpu as pltpu

# --- small config consistent with GPT_CONFIG_124M's structure ---
CFG = dict(
    vocab_size=101,
    context_length=16,
    emb_dim=32,
    n_heads=4,
    n_layers=2,
    drop_rate=0.0,
    qkv_bias=False,
)
OUT_UNITS = 1  # ClassificationModel(out_units=1) replaces the LM head


# ---------------------------------------------------------------------------
# In-kernel math helpers (f32 elementwise)
# ---------------------------------------------------------------------------
def _layernorm(x, scale, shift, eps=1e-5):
    mean = jnp.mean(x, axis=-1, keepdims=True)
    var = jnp.mean((x - mean) ** 2, axis=-1, keepdims=True)   # biased (PyTorch)
    return (x - mean) / jnp.sqrt(var + eps) * scale + shift


def _gelu_tanh(x):
    # GELU (tanh approximation), as in the reference GPT implementation.
    return 0.5 * x * (1.0 + jnp.tanh(
        math.sqrt(2.0 / math.pi) * (x + 0.044715 * x * x * x)))


# ---------------------------------------------------------------------------
# Fused kernel: all transformer blocks + final LayerNorm + out_head
# ---------------------------------------------------------------------------
def gpt_fused_kernel(x_ref, wqkv_ref, wo_ref, bo_ref,
                     w1_ref, b1_ref, w2_ref, b2_ref,
                     ln1s_ref, ln1b_ref, ln2s_ref, ln2b_ref,
                     fns_ref, fnb_ref, wout_ref,
                     o_ref, act_ref, *, n_heads, kv_tile):
    """grid = (batch_blocks, n_layers). One step applies transformer block `l`
    to one (B_tile*T, E) activation slab carried in VMEM scratch; the final LN
    + head are fused into the last layer step."""
    l = pl.program_id(1)
    n_layers = pl.num_programs(1)

    bt, T, E = x_ref.shape
    N = bt * T
    hd = E // n_heads
    num_kt = T // kv_tile

    # Load the embedded activations for this batch block at the first layer step.
    @pl.when(l == 0)
    def _():
        act_ref[...] = x_ref[...].reshape(N, E)

    x = act_ref[...]                                               # (N, E) f32

    # ---------------- causal multi-head attention (pre-LN) ----------------
    h = _layernorm(x, ln1s_ref[0], ln1b_ref[0])
    # One full-K matmul for fused Q|K|V (1/sqrt(hd) pre-folded into Q columns).
    qkv = jnp.dot(h.astype(jnp.bfloat16), wqkv_ref[0],
                  preferred_element_type=jnp.float32)              # (N, 3E)

    # Causal masks: one 2-D compare per key tile, reused across all heads.
    rows = lax.broadcasted_iota(jnp.int32, (T, kv_tile), 0)
    masks = []
    for kt in range(num_kt):
        cols = kt * kv_tile + lax.broadcasted_iota(jnp.int32, (T, kv_tile), 1)
        masks.append(cols <= rows)

    # Per-head attention with key-tiled online softmax (flash style).
    # TODO(synk): add query tiling for very long T; key tiling + per-head
    #             processing already bounds live intermediates to (bt, T, kv_tile).
    ctx_heads = []
    for hh in range(n_heads):
        q_h = qkv[:, hh * hd:(hh + 1) * hd].reshape(bt, T, hd).astype(jnp.bfloat16)
        k_h = qkv[:, E + hh * hd:E + (hh + 1) * hd].reshape(bt, T, hd).astype(jnp.bfloat16)
        v_h = qkv[:, 2 * E + hh * hd:2 * E + (hh + 1) * hd].reshape(bt, T, hd).astype(jnp.bfloat16)

        m_run = jnp.full((bt, T, 1), -jnp.inf, jnp.float32)
        l_run = jnp.zeros((bt, T, 1), jnp.float32)
        acc = jnp.zeros((bt, T, hd), jnp.float32)
        for kt in range(num_kt):
            k_t = k_h[:, kt * kv_tile:(kt + 1) * kv_tile, :]
            v_t = v_h[:, kt * kv_tile:(kt + 1) * kv_tile, :]
            s = jnp.einsum('btd,bsd->bts', q_h, k_t,
                           preferred_element_type=jnp.float32)     # (bt, T, kv_tile)
            s = jnp.where(masks[kt][None], s, -jnp.inf)            # causal
            m_new = jnp.maximum(m_run, jnp.max(s, axis=-1, keepdims=True))
            alpha = jnp.exp(m_run - m_new)
            p = jnp.exp(s - m_new)
            l_run = alpha * l_run + jnp.sum(p, axis=-1, keepdims=True)
            acc = alpha * acc + jnp.einsum('bts,bsd->btd',
                                           p.astype(jnp.bfloat16), v_t,
                                           preferred_element_type=jnp.float32)
            m_run = m_new
        ctx_h = acc * pl.reciprocal(l_run, approx=True)            # (bt, T, hd)
        ctx_heads.append(ctx_h.reshape(N, hd))

    ctx = jnp.concatenate(ctx_heads, axis=-1)                      # (N, E)
    proj = jnp.dot(ctx.astype(jnp.bfloat16), wo_ref[0],
                   preferred_element_type=jnp.float32)             # full-K out-proj
    x = x + proj + bo_ref[0]                                       # residual

    # ---------------- GELU feed-forward (pre-LN) ----------------
    h2 = _layernorm(x, ln2s_ref[0], ln2b_ref[0])
    f = jnp.dot(h2.astype(jnp.bfloat16), w1_ref[0],
                preferred_element_type=jnp.float32) + b1_ref[0]
    f = _gelu_tanh(f)
    f = jnp.dot(f.astype(jnp.bfloat16), w2_ref[0],
                preferred_element_type=jnp.float32) + b2_ref[0]
    x = x + f                                                       # residual

    act_ref[...] = x

    # -------- final LayerNorm + replaced out_head, fused into last layer --------
    @pl.when(l == n_layers - 1)
    def _():
        hf = _layernorm(x, fns_ref[...], fnb_ref[...])              # (N, E)
        # W_out is PyTorch-layout (out_units, E); emit lane-major (U, N) slab.
        logits = jnp.einsum('ue,ne->un', wout_ref[...], hf.astype(jnp.bfloat16),
                            preferred_element_type=jnp.float32)     # (U, N)
        o_ref[0] = logits


# ---------------------------------------------------------------------------
# pallas_call plumbing
# ---------------------------------------------------------------------------
def _layer_spec(shape):
    # Per-layer stacked weight (L, ...): block = one layer slab, indexed by the
    # layer grid axis -> the pipeline double-buffers the next layer's weights.
    block = (1,) + tuple(shape[1:])
    zeros = (0,) * (len(shape) - 1)
    return pl.BlockSpec(block, lambda b, l: (l,) + zeros)


def _shared_spec(shape):
    zeros = (0,) * len(shape)
    return pl.BlockSpec(tuple(shape), lambda b, l: zeros)


def gpt_forward_fused(x_emb, packed, cfg, *, b_tile=None):
    """x_emb: (B, T, E) f32 embedded inputs.  Returns (B, T, out_units) f32."""
    B, T, E = x_emb.shape
    L = cfg['n_layers']
    H = cfg['n_heads']
    U = packed['w_out'].shape[0]

    if b_tile is None:
        b_tile = B        # toy scale: whole batch per layer step -> grid (1, L)
    assert B % b_tile == 0
    nb = B // b_tile
    N = b_tile * T
    kv_tile = T if T <= 128 else 128
    assert T % kv_tile == 0

    layer_ws = [packed['wqkv'], packed['wo'], packed['bo'],
                packed['w1'], packed['b1'], packed['w2'], packed['b2'],
                packed['ln1_s'], packed['ln1_b'], packed['ln2_s'], packed['ln2_b']]
    shared_ws = [packed['fn_s'], packed['fn_b'], packed['w_out']]

    out = pl.pallas_call(
        functools.partial(gpt_fused_kernel, n_heads=H, kv_tile=kv_tile),
        out_shape=jax.ShapeDtypeStruct((nb, U, N), jnp.float32),
        grid_spec=pltpu.PrefetchScalarGridSpec(
            num_scalar_prefetch=0,
            grid=(nb, L),
            in_specs=[pl.BlockSpec((b_tile, T, E), lambda b, l: (b, 0, 0))]
                     + [_layer_spec(w.shape) for w in layer_ws]
                     + [_shared_spec(w.shape) for w in shared_ws],
            out_specs=pl.BlockSpec((1, U, N), lambda b, l: (b, 0, 0)),
            scratch_shapes=[pltpu.VMEM((N, E), jnp.float32)],
        ),
        compiler_params=pltpu.CompilerParams(
            # batch-block axis parallel (v7x megacore), layer axis sequential carry.
            dimension_semantics=("parallel", "arbitrary"),
            # Explicit VMEM budget; fits v5e/v6e (128 MiB) and v7x (64 MiB).
            vmem_limit_bytes=48 * 1024 * 1024),
    )(x_emb, *layer_ws, *shared_ws)

    # (nb, U, b_tile*T) lane-major head slab -> (B, T, U); out bias folded here
    # (avoids a (1,1) VMEM block in the kernel).
    out = out.reshape(nb, U, b_tile, T)
    out = jnp.transpose(out, (0, 2, 3, 1)).reshape(B, T, U)
    return out + packed['b_out'].reshape(1, 1, U)


def classification_model_forward(token_ids, packed, cfg):
    """Full forward pass of ClassificationModel."""
    B, T = token_ids.shape
    # Embedding gather + positional add (plain XLA glue; see TODO at top).
    x = jnp.take(packed['tok_emb'], token_ids, axis=0) \
        + packed['pos_emb'][:T][None, :, :]
    x = x.astype(jnp.float32)
    return gpt_forward_fused(x, packed, cfg)


# ---------------------------------------------------------------------------
# Parameter packing: per-block dicts -> layer-stacked bf16 slabs
# ---------------------------------------------------------------------------
def pack_params(params, cfg):
    E = cfg['emb_dim']
    H = cfg['n_heads']
    hd = E // H
    bf16 = jnp.bfloat16
    blocks = params['blocks']
    inv_sqrt_hd = 1.0 / math.sqrt(hd)

    def stack(name):
        return jnp.stack([blk[name] for blk in blocks], axis=0)

    # Fused Q|K|V weight, (E, 3E) per layer, with 1/sqrt(hd) folded into Wq.
    wqkv = jnp.stack(
        [jnp.concatenate([b['wq'] * inv_sqrt_hd, b['wk'], b['wv']], axis=-1)
         for b in blocks], axis=0)                                  # (L, E, 3E)
    wo = jnp.stack([b['wo'] for b in blocks], axis=0)               # (L, E, E)

    return dict(
        tok_emb=params['tok_emb'],
        pos_emb=params['pos_emb'],
        wqkv=wqkv.astype(bf16),
        wo=wo.astype(bf16),
        bo=stack('bo'),                       # (L, 1, E) f32
        w1=stack('w1').astype(bf16),          # (L, E, 4E)
        b1=stack('b1'),                       # (L, 1, 4E)
        w2=stack('w2').astype(bf16),          # (L, 4E, E)
        b2=stack('b2'),                       # (L, 1, E)
        ln1_s=stack('ln1_s'), ln1_b=stack('ln1_b'),
        ln2_s=stack('ln2_s'), ln2_b=stack('ln2_b'),
        fn_s=params['fn_s'], fn_b=params['fn_b'],
        w_out=params['w_out'].astype(bf16),   # (U, E)  PyTorch Linear (out, in)
        b_out=params['b_out'],                # (U, 1) — folded into the wrapper
    )


# ---------------------------------------------------------------------------
# Deterministic synthetic parameter initialization
# ---------------------------------------------------------------------------
def init_params(key, cfg, out_units):
    E = cfg['emb_dim']
    Hf = 4 * E
    keys = iter(jax.random.split(key, 64))

    def w(shape):
        return (0.02 * jax.random.normal(next(keys), shape)).astype(jnp.float32)

    params = dict(
        tok_emb=w((cfg['vocab_size'], E)),
        pos_emb=w((cfg['context_length'], E)),
        blocks=[],
        fn_s=jnp.ones((1, E), jnp.float32),
        fn_b=jnp.zeros((1, E), jnp.float32),
        w_out=w((out_units, E)),                     # replaced head: Linear(E, 1)
        b_out=jnp.zeros((out_units, 1), jnp.float32),
    )
    for _ in range(cfg['n_layers']):
        params['blocks'].append(dict(
            wq=w((E, E)), wk=w((E, E)), wv=w((E, E)),     # qkv_bias=False
            wo=w((E, E)), bo=jnp.zeros((1, E), jnp.float32),
            w1=w((E, Hf)), b1=jnp.zeros((1, Hf), jnp.float32),
            w2=w((Hf, E)), b2=jnp.zeros((1, E), jnp.float32),
            ln1_s=jnp.ones((1, E), jnp.float32),
            ln1_b=jnp.zeros((1, E), jnp.float32),
            ln2_s=jnp.ones((1, E), jnp.float32),
            ln2_b=jnp.zeros((1, E), jnp.float32),
        ))
    return params


# ---------------------------------------------------------------------------
if __name__ == "__main__":
    key = jax.random.PRNGKey(0)
    k_params, k_ids = jax.random.split(key)

    params = init_params(k_params, CFG, OUT_UNITS)
    packed = pack_params(params, CFG)

    B, T = 2, 8
    token_ids = jax.random.randint(k_ids, (B, T), 0, CFG['vocab_size'],
                                   dtype=jnp.int32)

    forward = jax.jit(functools.partial(classification_model_forward, cfg=CFG))
    logits = forward(token_ids, packed)
    logits = jax.block_until_ready(logits)

    assert logits.shape == (B, T, OUT_UNITS), logits.shape
    assert bool(jnp.all(jnp.isfinite(logits)))
    print("KERNEL_OK")
</pallas_src>

<mosaic_0001>
module attributes {stable_mosaic.version = 11 : i64} {
  func.func @gpt_fused_kernel(%arg0: i32, %arg1: i32, %arg2: memref<2x8x32xf32, #tpu.memory_space<vmem>>, %arg3: memref<1x32x96xbf16, #tpu.memory_space<vmem>>, %arg4: memref<1x32x32xbf16, #tpu.memory_space<vmem>>, %arg5: memref<1x1x32xf32, #tpu.memory_space<vmem>>, %arg6: memref<1x32x128xbf16, #tpu.memory_space<vmem>>, %arg7: memref<1x1x128xf32, #tpu.memory_space<vmem>>, %arg8: memref<1x128x32xbf16, #tpu.memory_space<vmem>>, %arg9: memref<1x1x32xf32, #tpu.memory_space<vmem>>, %arg10: memref<1x1x32xf32, #tpu.memory_space<vmem>>, %arg11: memref<1x1x32xf32, #tpu.memory_space<vmem>>, %arg12: memref<1x1x32xf32, #tpu.memory_space<vmem>>, %arg13: memref<1x1x32xf32, #tpu.memory_space<vmem>>, %arg14: memref<1x32xf32, #tpu.memory_space<vmem>>, %arg15: memref<1x32xf32, #tpu.memory_space<vmem>>, %arg16: memref<1x32xbf16, #tpu.memory_space<vmem>>, %arg17: memref<1x1x16xf32, #tpu.memory_space<vmem>>, %arg18: memref<16x32xf32, #tpu.memory_space<vmem>>) attributes {dimension_semantics = [#tpu.dimension_semantics<parallel>, #tpu.dimension_semantics<arbitrary>], iteration_bounds = array<i64: 1, 2>, scalar_prefetch = 0 : i64, scratch_operands = 1 : i64, tpu.core_type = #tpu.core_type<tc>, window_params = [{transform_indices = @transform_0, window_bounds = array<i64: 2, 8, 32>}, {transform_indices = @transform_1, window_bounds = array<i64: 1, 32, 96>}, {transform_indices = @transform_2, window_bounds = array<i64: 1, 32, 32>}, {transform_indices = @transform_3, window_bounds = array<i64: 1, 1, 32>}, {transform_indices = @transform_4, window_bounds = array<i64: 1, 32, 128>}, {transform_indices = @transform_5, window_bounds = array<i64: 1, 1, 128>}, {transform_indices = @transform_6, window_bounds = array<i64: 1, 128, 32>}, {transform_indices = @transform_7, window_bounds = array<i64: 1, 1, 32>}, {transform_indices = @transform_8, window_bounds = array<i64: 1, 1, 32>}, {transform_indices = @transform_9, window_bounds = array<i64: 1, 1, 32>}, {transform_indices = @transform_10, window_bounds = array<i64: 1, 1, 32>}, {transform_indices = @transform_11, window_bounds = array<i64: 1, 1, 32>}, {pipeline_mode = #tpu.pipeline_mode<synchronous>, transform_indices = @transform_12, window_bounds = array<i64: 1, 32>}, {pipeline_mode = #tpu.pipeline_mode<synchronous>, transform_indices = @transform_13, window_bounds = array<i64: 1, 32>}, {pipeline_mode = #tpu.pipeline_mode<synchronous>, transform_indices = @transform_14, window_bounds = array<i64: 1, 32>}, {transform_indices = @transform_15, window_bounds = array<i64: 1, 1, 16>}]} {
    %c0_i32 = arith.constant 0 : i32
    %0 = arith.cmpi eq, %arg1, %c0_i32 : i32
    %1 = arith.extui %0 : i1 to i32
    %c0_i32_0 = arith.constant 0 : i32
    %2 = arith.cmpi ne, %1, %c0_i32_0 : i32
    scf.if %2 {
      %c0_88 = arith.constant 0 : index
      %c0_89 = arith.constant 0 : index
      %c0_90 = arith.constant 0 : index
      %265 = vector.load %arg2[%c0_88, %c0_89, %c0_90] : memref<2x8x32xf32, #tpu.memory_space<vmem>>, vector<2x8x32xf32>
      %266 = vector.shape_cast %265 : vector<2x8x32xf32> to vector<16x32xf32>
      %c0_91 = arith.constant 0 : index
      %c0_92 = arith.constant 0 : index
      %267 = vector.load %arg18[%c0_91, %c0_92] : memref<16x32xf32, #tpu.memory_space<vmem>>, vector<16x32xf32>
      tpu.vector_store %arg18[%c0_91, %c0_92], %266 {strides = array<i32>} : memref<16x32xf32, #tpu.memory_space<vmem>>, vector<16x32xf32>,
    } else {
    }
    %c0 = arith.constant 0 : index
    %c0_1 = arith.constant 0 : index
    %3 = vector.load %arg18[%c0, %c0_1] : memref<16x32xf32, #tpu.memory_space<vmem>>, vector<16x32xf32>
    %c0_2 = arith.constant 0 : index
    %c0_3 = arith.constant 0 : index
    %c0_4 = arith.constant 0 : index
    %4 = vector.load %arg10[%c0_2, %c0_3, %c0_4] : memref<1x1x32xf32, #tpu.memory_space<vmem>>, vector<1x1x32xf32>
    %5 = vector.shape_cast %4 : vector<1x1x32xf32> to vector<1x32xf32>
    %c0_5 = arith.constant 0 : index
    %c0_6 = arith.constant 0 : index
    %c0_7 = arith.constant 0 : index
    %6 = vector.load %arg11[%c0_5, %c0_6, %c0_7] : memref<1x1x32xf32, #tpu.memory_space<vmem>>, vector<1x1x32xf32>
    %7 = vector.shape_cast %6 : vector<1x1x32xf32> to vector<1x32xf32>
    %cst = arith.constant dense<0.000000e+00> : vector<16xf32>
    %8 = vector.multi_reduction <add>, %3, %cst [1] : vector<16x32xf32> to vector<16xf32>
    %9 = vector.shape_cast %8 : vector<16xf32> to vector<16x1xf32>
    %cst_8 = arith.constant 3.200000e+01 : f32
    %10 = vector.broadcast %cst_8 : f32 to vector<16x1xf32>
    %11 = arith.divf %9, %10 : vector<16x1xf32>
    %12 = vector.broadcast %11 : vector<16x1xf32> to vector<16x32xf32>
    %13 = arith.subf %3, %12 : vector<16x32xf32>
    %14 = arith.mulf %13, %13 : vector<16x32xf32>
    %cst_9 = arith.constant dense<0.000000e+00> : vector<16xf32>
    %15 = vector.multi_reduction <add>, %14, %cst_9 [1] : vector<16x32xf32> to vector<16xf32>
    %16 = vector.shape_cast %15 : vector<16xf32> to vector<16x1xf32>
    %cst_10 = arith.constant 3.200000e+01 : f32
    %17 = vector.broadcast %cst_10 : f32 to vector<16x1xf32>
    %18 = arith.divf %16, %17 : vector<16x1xf32>
    %19 = vector.broadcast %11 : vector<16x1xf32> to vector<16x32xf32>
    %20 = arith.subf %3, %19 : vector<16x32xf32>
    %cst_11 = arith.constant 9.99999974E-6 : f32
    %21 = vector.broadcast %cst_11 : f32 to vector<16x1xf32>
    %22 = arith.addf %18, %21 : vector<16x1xf32>
    %23 = math.sqrt %22 : vector<16x1xf32>
    %24 = vector.broadcast %23 : vector<16x1xf32> to vector<16x32xf32>
    %25 = arith.divf %20, %24 : vector<16x32xf32>
    %26 = vector.broadcast %5 : vector<1x32xf32> to vector<16x32xf32>
    %27 = arith.mulf %25, %26 : vector<16x32xf32>
    %28 = vector.broadcast %7 : vector<1x32xf32> to vector<16x32xf32>
    %29 = arith.addf %27, %28 : vector<16x32xf32>
    %30 = arith.truncf %29 : vector<16x32xf32> to vector<16x32xbf16>
    %c0_12 = arith.constant 0 : index
    %c0_13 = arith.constant 0 : index
    %c0_14 = arith.constant 0 : index
    %31 = vector.load %arg3[%c0_12, %c0_13, %c0_14] : memref<1x32x96xbf16, #tpu.memory_space<vmem>>, vector<1x32x96xbf16>
    %32 = vector.shape_cast %31 : vector<1x32x96xbf16> to vector<32x96xbf16>
    %cst_15 = arith.constant dense<0.000000e+00> : vector<16x96xf32>
    %33 = tpu.matmul %30, %32, %cst_15 {dimension_numbers = #tpu.dot_dimension_numbers<[1], [0], [0], [1], [0, 0, 1, 1], [], []>} : vector<16x32xbf16>, vector<32x96xbf16>, vector<16x96xf32> -> vector<16x96xf32>
    %34 = tpu.iota {dimensions = array<i32: 0>} : vector<8x8xi32>
    %35 = tpu.iota {dimensions = array<i32: 1>} : vector<8x8xi32>
    %c0_i32_16 = arith.constant 0 : i32
    %36 = vector.broadcast %c0_i32_16 : i32 to vector<8x8xi32>
    %37 = arith.addi %36, %35 : vector<8x8xi32>
    %38 = arith.cmpi sle, %37, %34 : vector<8x8xi32>
    %39 = vector.extract_strided_slice %33 {offsets = [0, 0], sizes = [16, 8], strides = [1, 1]} : vector<16x96xf32> to vector<16x8xf32>
    %40 = vector.shape_cast %39 : vector<16x8xf32> to vector<2x8x8xf32>
    %41 = arith.truncf %40 : vector<2x8x8xf32> to vector<2x8x8xbf16>
    %42 = vector.extract_strided_slice %33 {offsets = [0, 32], sizes = [16, 8], strides = [1, 1]} : vector<16x96xf32> to vector<16x8xf32>
    %43 = vector.shape_cast %42 : vector<16x8xf32> to vector<2x8x8xf32>
    %44 = arith.truncf %43 : vector<2x8x8xf32> to vector<2x8x8xbf16>
    %45 = vector.extract_strided_slice %33 {offsets = [0, 64], sizes = [16, 8], strides = [1, 1]} : vector<16x96xf32> to vector<16x8xf32>
    %46 = vector.shape_cast %45 : vector<16x8xf32> to vector<2x8x8xf32>
    %47 = arith.truncf %46 : vector<2x8x8xf32> to vector<2x8x8xbf16>
    %cst_17 = arith.constant 0xFF800000 : f32
    %48 = vector.broadcast %cst_17 : f32 to vector<2x8x1xf32>
    %cst_18 = arith.constant 0.000000e+00 : f32
    %49 = vector.broadcast %cst_18 : f32 to vector<2x8x1xf32>
    %cst_19 = arith.constant 0.000000e+00 : f32
    %50 = vector.broadcast %cst_19 : f32 to vector<2x8x8xf32>
    "tpu.trace_start"() <{level = 10 : i32, message = "btd,bsd->bts"}> : () -> ()
    %cst_20 = arith.constant dense<0.000000e+00> : vector<2x8x8xf32>
    %51 = tpu.matmul %41, %44, %cst_20 {dimension_numbers = #tpu.dot_dimension_numbers<[2], [2], [1], [1], [0, 0, 0, 1, 1, 1], [0], [0]>} : vector<2x8x8xbf16>, vector<2x8x8xbf16>, vector<2x8x8xf32> -> vector<2x8x8xf32>
    "tpu.trace_stop"() : () -> ()
    %52 = vector.shape_cast %38 : vector<8x8xi1> to vector<1x8x8xi1>
    %cst_21 = arith.constant 0xFF800000 : f32
    %53 = vector.shape_cast %52 : vector<1x8x8xi1> to vector<1x8x8xi1>
    %54 = vector.broadcast %53 : vector<1x8x8xi1> to vector<2x8x8xi1>
    %55 = vector.broadcast %cst_21 : f32 to vector<2x8x8xf32>
    %56 = arith.select %54, %51, %55 : vector<2x8x8xi1>, vector<2x8x8xf32>
    %cst_22 = arith.constant dense<0xFF800000> : vector<2x8xf32>
    %57 = vector.multi_reduction <maximumf>, %56, %cst_22 [2] : vector<2x8x8xf32> to vector<2x8xf32>
    %58 = vector.shape_cast %57 : vector<2x8xf32> to vector<2x8x1xf32>
    %59 = arith.maximumf %48, %58 : vector<2x8x1xf32>
    %60 = arith.subf %48, %59 : vector<2x8x1xf32>
    %61 = math.exp %60 : vector<2x8x1xf32>
    %62 = vector.broadcast %59 : vector<2x8x1xf32> to vector<2x8x8xf32>
    %63 = arith.subf %56, %62 : vector<2x8x8xf32>
    %64 = math.exp %63 : vector<2x8x8xf32>
    %65 = arith.mulf %61, %49 : vector<2x8x1xf32>
    %cst_23 = arith.constant dense<0.000000e+00> : vector<2x8xf32>
    %66 = vector.multi_reduction <add>, %64, %cst_23 [2] : vector<2x8x8xf32> to vector<2x8xf32>
    %67 = vector.shape_cast %66 : vector<2x8xf32> to vector<2x8x1xf32>
    %68 = arith.addf %65, %67 : vector<2x8x1xf32>
    %69 = vector.broadcast %61 : vector<2x8x1xf32> to vector<2x8x8xf32>
    %70 = arith.mulf %69, %50 : vector<2x8x8xf32>
    %71 = arith.truncf %64 : vector<2x8x8xf32> to vector<2x8x8xbf16>
    "tpu.trace_start"() <{level = 10 : i32, message = "bts,bsd->btd"}> : () -> ()
    %cst_24 = arith.constant dense<0.000000e+00> : vector<2x8x8xf32>
    %72 = tpu.matmul %71, %47, %cst_24 {dimension_numbers = #tpu.dot_dimension_numbers<[2], [1], [1], [2], [0, 0, 0, 1, 1, 2], [0], [0]>} : vector<2x8x8xbf16>, vector<2x8x8xbf16>, vector<2x8x8xf32> -> vector<2x8x8xf32>
    "tpu.trace_stop"() : () -> ()
    %73 = arith.addf %70, %72 : vector<2x8x8xf32>
    %74 = tpu.reciprocal %68 {approx = true} : vector<2x8x1xf32> -> vector<2x8x1xf32>
    %75 = vector.broadcast %74 : vector<2x8x1xf32> to vector<2x8x8xf32>
    %76 = arith.mulf %73, %75 : vector<2x8x8xf32>
    %77 = vector.shape_cast %76 : vector<2x8x8xf32> to vector<16x8xf32>
    %78 = vector.extract_strided_slice %33 {offsets = [0, 8], sizes = [16, 8], strides = [1, 1]} : vector<16x96xf32> to vector<16x8xf32>
    %79 = vector.shape_cast %78 : vector<16x8xf32> to vector<2x8x8xf32>
    %80 = arith.truncf %79 : vector<2x8x8xf32> to vector<2x8x8xbf16>
    %81 = vector.extract_strided_slice %33 {offsets = [0, 40], sizes = [16, 8], strides = [1, 1]} : vector<16x96xf32> to vector<16x8xf32>
    %82 = vector.shape_cast %81 : vector<16x8xf32> to vector<2x8x8xf32>
    %83 = arith.truncf %82 : vector<2x8x8xf32> to vector<2x8x8xbf16>
    %84 = vector.extract_strided_slice %33 {offsets = [0, 72], sizes = [16, 8], strides = [1, 1]} : vector<16x96xf32> to vector<16x8xf32>
    %85 = vector.shape_cast %84 : vector<16x8xf32> to vector<2x8x8xf32>
    %86 = arith.truncf %85 : vector<2x8x8xf32> to vector<2x8x8xbf16>
    %cst_25 = arith.constant 0xFF800000 : f32
    %87 = vector.broadcast %cst_25 : f32 to vector<2x8x1xf32>
    %cst_26 = arith.constant 0.000000e+00 : f32
    %88 = vector.broadcast %cst_26 : f32 to vector<2x8x1xf32>
    %cst_27 = arith.constant 0.000000e+00 : f32
    %89 = vector.broadcast %cst_27 : f32 to vector<2x8x8xf32>
    "tpu.trace_start"() <{level = 10 : i32, message = "btd,bsd->bts"}> : () -> ()
    %cst_28 = arith.constant dense<0.000000e+00> : vector<2x8x8xf32>
    %90 = tpu.matmul %80, %83, %cst_28 {dimension_numbers = #tpu.dot_dimension_numbers<[2], [2], [1], [1], [0, 0, 0, 1, 1, 1], [0], [0]>} : vector<2x8x8xbf16>, vector<2x8x8xbf16>, vector<2x8x8xf32> -> vector<2x8x8xf32>
    "tpu.trace_stop"() : () -> ()
    %91 = vector.shape_cast %38 : vector<8x8xi1> to vector<1x8x8xi1>
    %cst_29 = arith.constant 0xFF800000 : f32
    %92 = vector.shape_cast %91 : vector<1x8x8xi1> to vector<1x8x8xi1>
    %93 = vector.broadcast %92 : vector<1x8x8xi1> to vector<2x8x8xi1>
    %94 = vector.broadcast %cst_29 : f32 to vector<2x8x8xf32>
    %95 = arith.select %93, %90, %94 : vector<2x8x8xi1>, vector<2x8x8xf32>
    %cst_30 = arith.constant dense<0xFF800000> : vector<2x8xf32>
    %96 = vector.multi_reduction <maximumf>, %95, %cst_30 [2] : vector<2x8x8xf32> to vector<2x8xf32>
    %97 = vector.shape_cast %96 : vector<2x8xf32> to vector<2x8x1xf32>
    %98 = arith.maximumf %87, %97 : vector<2x8x1xf32>
    %99 = arith.subf %87, %98 : vector<2x8x1xf32>
    %100 = math.exp %99 : vector<2x8x1xf32>
    %101 = vector.broadcast %98 : vector<2x8x1xf32> to vector<2x8x8xf32>
    %102 = arith.subf %95, %101 : vector<2x8x8xf32>
    %103 = math.exp %102 : vector<2x8x8xf32>
    %104 = arith.mulf %100, %88 : vector<2x8x1xf32>
    %cst_31 = arith.constant dense<0.000000e+00> : vector<2x8xf32>
    %105 = vector.multi_reduction <add>, %103, %cst_31 [2] : vector<2x8x8xf32> to vector<2x8xf32>
    %106 = vector.shape_cast %105 : vector<2x8xf32> to vector<2x8x1xf32>
    %107 = arith.addf %104, %106 : vector<2x8x1xf32>
    %108 = vector.broadcast %100 : vector<2x8x1xf32> to vector<2x8x8xf32>
    %109 = arith.mulf %108, %89 : vector<2x8x8xf32>
    %110 = arith.truncf %103 : vector<2x8x8xf32> to vector<2x8x8xbf16>
    "tpu.trace_start"() <{level = 10 : i32, message = "bts,bsd->btd"}> : () -> ()
    %cst_32 = arith.constant dense<0.000000e+00> : vector<2x8x8xf32>
    %111 = tpu.matmul %110, %86, %cst_32 {dimension_numbers = #tpu.dot_dimension_numbers<[2], [1], [1], [2], [0, 0, 0, 1, 1, 2], [0], [0]>} : vector<2x8x8xbf16>, vector<2x8x8xbf16>, vector<2x8x8xf32> -> vector<2x8x8xf32>
    "tpu.trace_stop"() : () -> ()
    %112 = arith.addf %109, %111 : vector<2x8x8xf32>
    %113 = tpu.reciprocal %107 {approx = true} : vector<2x8x1xf32> -> vector<2x8x1xf32>
    %114 = vector.broadcast %113 : vector<2x8x1xf32> to vector<2x8x8xf32>
    %115 = arith.mulf %112, %114 : vector<2x8x8xf32>
    %116 = vector.shape_cast %115 : vector<2x8x8xf32> to vector<16x8xf32>
    %117 = vector.extract_strided_slice %33 {offsets = [0, 16], sizes = [16, 8], strides = [1, 1]} : vector<16x96xf32> to vector<16x8xf32>
    %118 = vector.shape_cast %117 : vector<16x8xf32> to vector<2x8x8xf32>
    %119 = arith.truncf %118 : vector<2x8x8xf32> to vector<2x8x8xbf16>
    %120 = vector.extract_strided_slice %33 {offsets = [0, 48], sizes = [16, 8], strides = [1, 1]} : vector<16x96xf32> to vector<16x8xf32>
    %121 = vector.shape_cast %120 : vector<16x8xf32> to vector<2x8x8xf32>
    %122 = arith.truncf %121 : vector<2x8x8xf32> to vector<2x8x8xbf16>
    %123 = vector.extract_strided_slice %33 {offsets = [0, 80], sizes = [16, 8], strides = [1, 1]} : vector<16x96xf32> to vector<16x8xf32>
    %124 = vector.shape_cast %123 : vector<16x8xf32> to vector<2x8x8xf32>
    %125 = arith.truncf %124 : vector<2x8x8xf32> to vector<2x8x8xbf16>
    %cst_33 = arith.constant 0xFF800000 : f32
    %126 = vector.broadcast %cst_33 : f32 to vector<2x8x1xf32>
    %cst_34 = arith.constant 0.000000e+00 : f32
    %127 = vector.broadcast %cst_34 : f32 to vector<2x8x1xf32>
    %cst_35 = arith.constant 0.000000e+00 : f32
    %128 = vector.broadcast %cst_35 : f32 to vector<2x8x8xf32>
    "tpu.trace_start"() <{level = 10 : i32, message = "btd,bsd->bts"}> : () -> ()
    %cst_36 = arith.constant dense<0.000000e+00> : vector<2x8x8xf32>
    %129 = tpu.matmul %119, %122, %cst_36 {dimension_numbers = #tpu.dot_dimension_numbers<[2], [2], [1], [1], [0, 0, 0, 1, 1, 1], [0], [0]>} : vector<2x8x8xbf16>, vector<2x8x8xbf16>, vector<2x8x8xf32> -> vector<2x8x8xf32>
    "tpu.trace_stop"() : () -> ()
    %130 = vector.shape_cast %38 : vector<8x8xi1> to vector<1x8x8xi1>
    %cst_37 = arith.constant 0xFF800000 : f32
    %131 = vector.shape_cast %130 : vector<1x8x8xi1> to vector<1x8x8xi1>
    %132 = vector.broadcast %131 : vector<1x8x8xi1> to vector<2x8x8xi1>
    %133 = vector.broadcast %cst_37 : f32 to vector<2x8x8xf32>
    %134 = arith.select %132, %129, %133 : vector<2x8x8xi1>, vector<2x8x8xf32>
    %cst_38 = arith.constant dense<0xFF800000> : vector<2x8xf32>
    %135 = vector.multi_reduction <maximumf>, %134, %cst_38 [2] : vector<2x8x8xf32> to vector<2x8xf32>
    %136 = vector.shape_cast %135 : vector<2x8xf32> to vector<2x8x1xf32>
    %137 = arith.maximumf %126, %136 : vector<2x8x1xf32>
    %138 = arith.subf %126, %137 : vector<2x8x1xf32>
    %139 = math.exp %138 : vector<2x8x1xf32>
    %140 = vector.broadcast %137 : vector<2x8x1xf32> to vector<2x8x8xf32>
    %141 = arith.subf %134, %140 : vector<2x8x8xf32>
    %142 = math.exp %141 : vector<2x8x8xf32>
    %143 = arith.mulf %139, %127 : vector<2x8x1xf32>
    %cst_39 = arith.constant dense<0.000000e+00> : vector<2x8xf32>
    %144 = vector.multi_reduction <add>, %142, %cst_39 [2] : vector<2x8x8xf32> to vector<2x8xf32>
    %145 = vector.shape_cast %144 : vector<2x8xf32> to vector<2x8x1xf32>
    %146 = arith.addf %143, %145 : vector<2x8x1xf32>
    %147 = vector.broadcast %139 : vector<2x8x1xf32> to vector<2x8x8xf32>
    %148 = arith.mulf %147, %128 : vector<2x8x8xf32>
    %149 = arith.truncf %142 : vector<2x8x8xf32> to vector<2x8x8xbf16>
    "tpu.trace_start"() <{level = 10 : i32, message = "bts,bsd->btd"}> : () -> ()
    %cst_40 = arith.constant dense<0.000000e+00> : vector<2x8x8xf32>
    %150 = tpu.matmul %149, %125, %cst_40 {dimension_numbers = #tpu.dot_dimension_numbers<[2], [1], [1], [2], [0, 0, 0, 1, 1, 2], [0], [0]>} : vector<2x8x8xbf16>, vector<2x8x8xbf16>, vector<2x8x8xf32> -> vector<2x8x8xf32>
    "tpu.trace_stop"() : () -> ()
    %151 = arith.addf %148, %150 : vector<2x8x8xf32>
    %152 = tpu.reciprocal %146 {approx = true} : vector<2x8x1xf32> -> vector<2x8x1xf32>
    %153 = vector.broadcast %152 : vector<2x8x1xf32> to vector<2x8x8xf32>
    %154 = arith.mulf %151, %153 : vector<2x8x8xf32>
    %155 = vector.shape_cast %154 : vector<2x8x8xf32> to vector<16x8xf32>
    %156 = vector.extract_strided_slice %33 {offsets = [0, 24], sizes = [16, 8], strides = [1, 1]} : vector<16x96xf32> to vector<16x8xf32>
    %157 = vector.shape_cast %156 : vector<16x8xf32> to vector<2x8x8xf32>
    %158 = arith.truncf %157 : vector<2x8x8xf32> to vector<2x8x8xbf16>
    %159 = vector.extract_strided_slice %33 {offsets = [0, 56], sizes = [16, 8], strides = [1, 1]} : vector<16x96xf32> to vector<16x8xf32>
    %160 = vector.shape_cast %159 : vector<16x8xf32> to vector<2x8x8xf32>
    %161 = arith.truncf %160 : vector<2x8x8xf32> to vector<2x8x8xbf16>
    %162 = vector.extract_strided_slice %33 {offsets = [0, 88], sizes = [16, 8], strides = [1, 1]} : vector<16x96xf32> to vector<16x8xf32>
    %163 = vector.shape_cast %162 : vector<16x8xf32> to vector<2x8x8xf32>
    %164 = arith.truncf %163 : vector<2x8x8xf32> to vector<2x8x8xbf16>
    %cst_41 = arith.constant 0xFF800000 : f32
    %165 = vector.broadcast %cst_41 : f32 to vector<2x8x1xf32>
    %cst_42 = arith.constant 0.000000e+00 : f32
    %166 = vector.broadcast %cst_42 : f32 to vector<2x8x1xf32>
    %cst_43 = arith.constant 0.000000e+00 : f32
    %167 = vector.broadcast %cst_43 : f32 to vector<2x8x8xf32>
    "tpu.trace_start"() <{level = 10 : i32, message = "btd,bsd->bts"}> : () -> ()
    %cst_44 = arith.constant dense<0.000000e+00> : vector<2x8x8xf32>
    %168 = tpu.matmul %158, %161, %cst_44 {dimension_numbers = #tpu.dot_dimension_numbers<[2], [2], [1], [1], [0, 0, 0, 1, 1, 1], [0], [0]>} : vector<2x8x8xbf16>, vector<2x8x8xbf16>, vector<2x8x8xf32> -> vector<2x8x8xf32>
    "tpu.trace_stop"() : () -> ()
    %169 = vector.shape_cast %38 : vector<8x8xi1> to vector<1x8x8xi1>
    %cst_45 = arith.constant 0xFF800000 : f32
    %170 = vector.shape_cast %169 : vector<1x8x8xi1> to vector<1x8x8xi1>
    %171 = vector.broadcast %170 : vector<1x8x8xi1> to vector<2x8x8xi1>
    %172 = vector.broadcast %cst_45 : f32 to vector<2x8x8xf32>
    %173 = arith.select %171, %168, %172 : vector<2x8x8xi1>, vector<2x8x8xf32>
    %cst_46 = arith.constant dense<0xFF800000> : vector<2x8xf32>
    %174 = vector.multi_reduction <maximumf>, %173, %cst_46 [2] : vector<2x8x8xf32> to vector<2x8xf32>
    %175 = vector.shape_cast %174 : vector<2x8xf32> to vector<2x8x1xf32>
    %176 = arith.maximumf %165, %175 : vector<2x8x1xf32>
    %177 = arith.subf %165, %176 : vector<2x8x1xf32>
    %178 = math.exp %177 : vector<2x8x1xf32>
    %179 = vector.broadcast %176 : vector<2x8x1xf32> to vector<2x8x8xf32>
    %180 = arith.subf %173, %179 : vector<2x8x8xf32>
    %181 = math.exp %180 : vector<2x8x8xf32>
    %182 = arith.mulf %178, %166 : vector<2x8x1xf32>
    %cst_47 = arith.constant dense<0.000000e+00> : vector<2x8xf32>
    %183 = vector.multi_reduction <add>, %181, %cst_47 [2] : vector<2x8x8xf32> to vector<2x8xf32>
    %184 = vector.shape_cast %183 : vector<2x8xf32> to vector<2x8x1xf32>
    %185 = arith.addf %182, %184 : vector<2x8x1xf32>
    %186 = vector.broadcast %178 : vector<2x8x1xf32> to vector<2x8x8xf32>
    %187 = arith.mulf %186, %167 : vector<2x8x8xf32>
    %188 = arith.truncf %181 : vector<2x8x8xf32> to vector<2x8x8xbf16>
    "tpu.trace_start"() <{level = 10 : i32, message = "bts,bsd->btd"}> : () -> ()
    %cst_48 = arith.constant dense<0.000000e+00> : vector<2x8x8xf32>
    %189 = tpu.matmul %188, %164, %cst_48 {dimension_numbers = #tpu.dot_dimension_numbers<[2], [1], [1], [2], [0, 0, 0, 1, 1, 2], [0], [0]>} : vector<2x8x8xbf16>, vector<2x8x8xbf16>, vector<2x8x8xf32> -> vector<2x8x8xf32>
    "tpu.trace_stop"() : () -> ()
    %190 = arith.addf %187, %189 : vector<2x8x8xf32>
    %191 = tpu.reciprocal %185 {approx = true} : vector<2x8x1xf32> -> vector<2x8x1xf32>
    %192 = vector.broadcast %191 : vector<2x8x1xf32> to vector<2x8x8xf32>
    %193 = arith.mulf %190, %192 : vector<2x8x8xf32>
    %194 = vector.shape_cast %193 : vector<2x8x8xf32> to vector<16x8xf32>
    %195 = tpu.concatenate %77, %116, %155, %194 in 1 : vector<16x8xf32>, vector<16x8xf32>, vector<16x8xf32>, vector<16x8xf32> -> vector<16x32xf32>
    %196 = arith.truncf %195 : vector<16x32xf32> to vector<16x32xbf16>
    %c0_49 = arith.constant 0 : index
    %c0_50 = arith.constant 0 : index
    %c0_51 = arith.constant 0 : index
    %197 = vector.load %arg4[%c0_49, %c0_50, %c0_51] : memref<1x32x32xbf16, #tpu.memory_space<vmem>>, vector<1x32x32xbf16>
    %198 = vector.shape_cast %197 : vector<1x32x32xbf16> to vector<32x32xbf16>
    %cst_52 = arith.constant dense<0.000000e+00> : vector<16x32xf32>
    %199 = tpu.matmul %196, %198, %cst_52 {dimension_numbers = #tpu.dot_dimension_numbers<[1], [0], [0], [1], [0, 0, 1, 1], [], []>} : vector<16x32xbf16>, vector<32x32xbf16>, vector<16x32xf32> -> vector<16x32xf32>
    %200 = arith.addf %3, %199 : vector<16x32xf32>
    %c0_53 = arith.constant 0 : index
    %c0_54 = arith.constant 0 : index
    %c0_55 = arith.constant 0 : index
    %201 = vector.load %arg5[%c0_53, %c0_54, %c0_55] : memref<1x1x32xf32, #tpu.memory_space<vmem>>, vector<1x1x32xf32>
    %202 = vector.shape_cast %201 : vector<1x1x32xf32> to vector<1x32xf32>
    %203 = vector.broadcast %202 : vector<1x32xf32> to vector<16x32xf32>
    %204 = arith.addf %200, %203 : vector<16x32xf32>
    %c0_56 = arith.constant 0 : index
    %c0_57 = arith.constant 0 : index
    %c0_58 = arith.constant 0 : index
    %205 = vector.load %arg12[%c0_56, %c0_57, %c0_58] : memref<1x1x32xf32, #tpu.memory_space<vmem>>, vector<1x1x32xf32>
    %206 = vector.shape_cast %205 : vector<1x1x32xf32> to vector<1x32xf32>
    %c0_59 = arith.constant 0 : index
    %c0_60 = arith.constant 0 : index
    %c0_61 = arith.constant 0 : index
    %207 = vector.load %arg13[%c0_59, %c0_60, %c0_61] : memref<1x1x32xf32, #tpu.memory_space<vmem>>, vector<1x1x32xf32>
    %208 = vector.shape_cast %207 : vector<1x1x32xf32> to vector<1x32xf32>
    %cst_62 = arith.constant dense<0.000000e+00> : vector<16xf32>
    %209 = vector.multi_reduction <add>, %204, %cst_62 [1] : vector<16x32xf32> to vector<16xf32>
    %210 = vector.shape_cast %209 : vector<16xf32> to vector<16x1xf32>
    %cst_63 = arith.constant 3.200000e+01 : f32
    %211 = vector.broadcast %cst_63 : f32 to vector<16x1xf32>
    %212 = arith.divf %210, %211 : vector<16x1xf32>
    %213 = vector.broadcast %212 : vector<16x1xf32> to vector<16x32xf32>
    %214 = arith.subf %204, %213 : vector<16x32xf32>
    %215 = arith.mulf %214, %214 : vector<16x32xf32>
    %cst_64 = arith.constant dense<0.000000e+00> : vector<16xf32>
    %216 = vector.multi_reduction <add>, %215, %cst_64 [1] : vector<16x32xf32> to vector<16xf32>
    %217 = vector.shape_cast %216 : vector<16xf32> to vector<16x1xf32>
    %cst_65 = arith.constant 3.200000e+01 : f32
    %218 = vector.broadcast %cst_65 : f32 to vector<16x1xf32>
    %219 = arith.divf %217, %218 : vector<16x1xf32>
    %220 = vector.broadcast %212 : vector<16x1xf32> to vector<16x32xf32>
    %221 = arith.subf %204, %220 : vector<16x32xf32>
    %cst_66 = arith.constant 9.99999974E-6 : f32
    %222 = vector.broadcast %cst_66 : f32 to vector<16x1xf32>
    %223 = arith.addf %219, %222 : vector<16x1xf32>
    %224 = math.sqrt %223 : vector<16x1xf32>
    %225 = vector.broadcast %224 : vector<16x1xf32> to vector<16x32xf32>
    %226 = arith.divf %221, %225 : vector<16x32xf32>
    %227 = vector.broadcast %206 : vector<1x32xf32> to vector<16x32xf32>
    %228 = arith.mulf %226, %227 : vector<16x32xf32>
    %229 = vector.broadcast %208 : vector<1x32xf32> to vector<16x32xf32>
    %230 = arith.addf %228, %229 : vector<16x32xf32>
    %231 = arith.truncf %230 : vector<16x32xf32> to vector<16x32xbf16>
    %c0_67 = arith.constant 0 : index
    %c0_68 = arith.constant 0 : index
    %c0_69 = arith.constant 0 : index
    %232 = vector.load %arg6[%c0_67, %c0_68, %c0_69] : memref<1x32x128xbf16, #tpu.memory_space<vmem>>, vector<1x32x128xbf16>
    %233 = vector.shape_cast %232 : vector<1x32x128xbf16> to vector<32x128xbf16>
    %cst_70 = arith.constant dense<0.000000e+00> : vector<16x128xf32>
    %234 = tpu.matmul %231, %233, %cst_70 {dimension_numbers = #tpu.dot_dimension_numbers<[1], [0], [0], [1], [0, 0, 1, 1], [], []>} : vector<16x32xbf16>, vector<32x128xbf16>, vector<16x128xf32> -> vector<16x128xf32>
    %c0_71 = arith.constant 0 : index
    %c0_72 = arith.constant 0 : index
    %c0_73 = arith.constant 0 : index
    %235 = vector.load %arg7[%c0_71, %c0_72, %c0_73] : memref<1x1x128xf32, #tpu.memory_space<vmem>>, vector<1x1x128xf32>
    %236 = vector.shape_cast %235 : vector<1x1x128xf32> to vector<1x128xf32>
    %237 = vector.broadcast %236 : vector<1x128xf32> to vector<16x128xf32>
    %238 = arith.addf %234, %237 : vector<16x128xf32>
    %cst_74 = arith.constant 5.000000e-01 : f32
    %239 = vector.broadcast %cst_74 : f32 to vector<16x128xf32>
    %240 = arith.mulf %239, %238 : vector<16x128xf32>
    %cst_75 = arith.constant 4.471500e-02 : f32
    %241 = vector.broadcast %cst_75 : f32 to vector<16x128xf32>
    %242 = arith.mulf %241, %238 : vector<16x128xf32>
    %243 = arith.mulf %242, %238 : vector<16x128xf32>
    %244 = arith.mulf %243, %238 : vector<16x128xf32>
    %245 = arith.addf %238, %244 : vector<16x128xf32>
    %cst_76 = arith.constant 0.797884583 : f32
    %246 = vector.broadcast %cst_76 : f32 to vector<16x128xf32>
    %247 = arith.mulf %246, %245 : vector<16x128xf32>
    %248 = math.tanh %247 : vector<16x128xf32>
    %cst_77 = arith.constant 1.000000e+00 : f32
    %249 = vector.broadcast %cst_77 : f32 to vector<16x128xf32>
    %250 = arith.addf %249, %248 : vector<16x128xf32>
    %251 = arith.mulf %240, %250 : vector<16x128xf32>
    %252 = arith.truncf %251 : vector<16x128xf32> to vector<16x128xbf16>
    %c0_78 = arith.constant 0 : index
    %c0_79 = arith.constant 0 : index
    %c0_80 = arith.constant 0 : index
    %253 = vector.load %arg8[%c0_78, %c0_79, %c0_80] : memref<1x128x32xbf16, #tpu.memory_space<vmem>>, vector<1x128x32xbf16>
    %254 = vector.shape_cast %253 : vector<1x128x32xbf16> to vector<128x32xbf16>
    %cst_81 = arith.constant dense<0.000000e+00> : vector<16x32xf32>
    %255 = tpu.matmul %252, %254, %cst_81 {dimension_numbers = #tpu.dot_dimension_numbers<[1], [0], [0], [1], [0, 0, 1, 1], [], []>} : vector<16x128xbf16>, vector<128x32xbf16>, vector<16x32xf32> -> vector<16x32xf32>
    %c0_82 = arith.constant 0 : index
    %c0_83 = arith.constant 0 : index
    %c0_84 = arith.constant 0 : index
    %256 = vector.load %arg9[%c0_82, %c0_83, %c0_84] : memref<1x1x32xf32, #tpu.memory_space<vmem>>, vector<1x1x32xf32>
    %257 = vector.shape_cast %256 : vector<1x1x32xf32> to vector<1x32xf32>
    %258 = vector.broadcast %257 : vector<1x32xf32> to vector<16x32xf32>
    %259 = arith.addf %255, %258 : vector<16x32xf32>
    %260 = arith.addf %204, %259 : vector<16x32xf32>
    %c0_85 = arith.constant 0 : index
    %c0_86 = arith.constant 0 : index
    %261 = vector.load %arg18[%c0_85, %c0_86] : memref<16x32xf32, #tpu.memory_space<vmem>>, vector<16x32xf32>
    tpu.vector_store %arg18[%c0_85, %c0_86], %260 {strides = array<i32>} : memref<16x32xf32, #tpu.memory_space<vmem>>, vector<16x32xf32>,
    %c1_i32 = arith.constant 1 : i32
    %262 = arith.cmpi eq, %arg1, %c1_i32 : i32
    %263 = arith.extui %262 : i1 to i32
    %c0_i32_87 = arith.constant 0 : i32
    %264 = arith.cmpi ne, %263, %c0_i32_87 : i32
    scf.if %264 {
      %c0_88 = arith.constant 0 : index
      %c0_89 = arith.constant 0 : index
      %265 = vector.load %arg14[%c0_88, %c0_89] : memref<1x32xf32, #tpu.memory_space<vmem>>, vector<1x32xf32>
      %c0_90 = arith.constant 0 : index
      %c0_91 = arith.constant 0 : index
      %266 = vector.load %arg15[%c0_90, %c0_91] : memref<1x32xf32, #tpu.memory_space<vmem>>, vector<1x32xf32>
      %cst_92 = arith.constant dense<0.000000e+00> : vector<16xf32>
      %267 = vector.multi_reduction <add>, %260, %cst_92 [1] : vector<16x32xf32> to vector<16xf32>
      %268 = vector.shape_cast %267 : vector<16xf32> to vector<16x1xf32>
      %cst_93 = arith.constant 3.200000e+01 : f32
      %269 = vector.broadcast %cst_93 : f32 to vector<16x1xf32>
      %270 = arith.divf %268, %269 : vector<16x1xf32>
      %271 = vector.broadcast %270 : vector<16x1xf32> to vector<16x32xf32>
      %272 = arith.subf %260, %271 : vector<16x32xf32>
      %273 = arith.mulf %272, %272 : vector<16x32xf32>
      %cst_94 = arith.constant dense<0.000000e+00> : vector<16xf32>
      %274 = vector.multi_reduction <add>, %273, %cst_94 [1] : vector<16x32xf32> to vector<16xf32>
      %275 = vector.shape_cast %274 : vector<16xf32> to vector<16x1xf32>
      %cst_95 = arith.constant 3.200000e+01 : f32
      %276 = vector.broadcast %cst_95 : f32 to vector<16x1xf32>
      %277 = arith.divf %275, %276 : vector<16x1xf32>
      %278 = vector.broadcast %270 : vector<16x1xf32> to vector<16x32xf32>
      %279 = arith.subf %260, %278 : vector<16x32xf32>
      %cst_96 = arith.constant 9.99999974E-6 : f32
      %280 = vector.broadcast %cst_96 : f32 to vector<16x1xf32>
      %281 = arith.addf %277, %280 : vector<16x1xf32>
      %282 = math.sqrt %281 : vector<16x1xf32>
      %283 = vector.broadcast %282 : vector<16x1xf32> to vector<16x32xf32>
      %284 = arith.divf %279, %283 : vector<16x32xf32>
      %285 = vector.broadcast %265 : vector<1x32xf32> to vector<16x32xf32>
      %286 = arith.mulf %284, %285 : vector<16x32xf32>
      %287 = vector.broadcast %266 : vector<1x32xf32> to vector<16x32xf32>
      %288 = arith.addf %286, %287 : vector<16x32xf32>
      %c0_97 = arith.constant 0 : index
      %c0_98 = arith.constant 0 : index
      %289 = vector.load %arg16[%c0_97, %c0_98] : memref<1x32xbf16, #tpu.memory_space<vmem>>, vector<1x32xbf16>
      %290 = arith.truncf %288 : vector<16x32xf32> to vector<16x32xbf16>
      "tpu.trace_start"() <{level = 10 : i32, message = "ue,ne->un"}> : () -> ()
      %cst_99 = arith.constant dense<0.000000e+00> : vector<1x16xf32>
      %291 = tpu.matmul %289, %290, %cst_99 {dimension_numbers = #tpu.dot_dimension_numbers<[1], [1], [0], [0], [0, 0, 1, 0], [], []>} : vector<1x32xbf16>, vector<16x32xbf16>, vector<1x16xf32> -> vector<1x16xf32>
      "tpu.trace_stop"() : () -> ()
      %c0_100 = arith.constant 0 : index
      %c0_101 = arith.constant 0 : index
      %c0_102 = arith.constant 0 : index
      %292 = vector.load %arg17[%c0_100, %c0_101, %c0_102] : memref<1x1x16xf32, #tpu.memory_space<vmem>>, vector<1x1x16xf32>
      %293 = vector.shape_cast %292 : vector<1x1x16xf32> to vector<1x16xf32>
      %294 = vector.shape_cast %291 : vector<1x16xf32> to vector<1x1x16xf32>
      tpu.vector_store %arg17[%c0_100, %c0_101, %c0_102], %294 {strides = array<i32>} : memref<1x1x16xf32, #tpu.memory_space<vmem>>, vector<1x1x16xf32>,
    } else {
    }
    return
  }
  func.func @transform_0(%arg0: i32, %arg1: i32) -> (i32, i32, i32) {
    %c0_i32 = arith.constant 0 : i32
    %c0_i32_0 = arith.constant 0 : i32
    %c0_i32_1 = arith.constant 0 : i32
    return %arg0, %c0_i32, %c0_i32_0 : i32, i32, i32
  }
  func.func @transform_1(%arg0: i32, %arg1: i32) -> (i32, i32, i32) {
    %c0_i32 = arith.constant 0 : i32
    %c0_i32_0 = arith.constant 0 : i32
    %c0_i32_1 = arith.constant 0 : i32
    return %arg1, %c0_i32, %c0_i32_0 : i32, i32, i32
  }
  func.func @transform_2(%arg0: i32, %arg1: i32) -> (i32, i32, i32) {
    %c0_i32 = arith.constant 0 : i32
    %c0_i32_0 = arith.constant 0 : i32
    %c0_i32_1 = arith.constant 0 : i32
    return %arg1, %c0_i32, %c0_i32_0 : i32, i32, i32
  }
  func.func @transform_3(%arg0: i32, %arg1: i32) -> (i32, i32, i32) {
    %c0_i32 = arith.constant 0 : i32
    %c0_i32_0 = arith.constant 0 : i32
    %c0_i32_1 = arith.constant 0 : i32
    return %arg1, %c0_i32, %c0_i32_0 : i32, i32, i32
  }
  func.func @transform_4(%arg0: i32, %arg1: i32) -> (i32, i32, i32) {
    %c0_i32 = arith.constant 0 : i32
    %c0_i32_0 = arith.constant 0 : i32
    %c0_i32_1 = arith.constant 0 : i32
    return %arg1, %c0_i32, %c0_i32_0 : i32, i32, i32
  }
  func.func @transform_5(%arg0: i32, %arg1: i32) -> (i32, i32, i32) {
    %c0_i32 = arith.constant 0 : i32
    %c0_i32_0 = arith.constant 0 : i32
    %c0_i32_1 = arith.constant 0 : i32
    return %arg1, %c0_i32, %c0_i32_0 : i32, i32, i32
  }
  func.func @transform_6(%arg0: i32, %arg1: i32) -> (i32, i32, i32) {
    %c0_i32 = arith.constant 0 : i32
    %c0_i32_0 = arith.constant 0 : i32
    %c0_i32_1 = arith.constant 0 : i32
    return %arg1, %c0_i32, %c0_i32_0 : i32, i32, i32
  }
  func.func @transform_7(%arg0: i32, %arg1: i32) -> (i32, i32, i32) {
    %c0_i32 = arith.constant 0 : i32
    %c0_i32_0 = arith.constant 0 : i32
    %c0_i32_1 = arith.constant 0 : i32
    return %arg1, %c0_i32, %c0_i32_0 : i32, i32, i32
  }
  func.func @transform_8(%arg0: i32, %arg1: i32) -> (i32, i32, i32) {
    %c0_i32 = arith.constant 0 : i32
    %c0_i32_0 = arith.constant 0 : i32
    %c0_i32_1 = arith.constant 0 : i32
    return %arg1, %c0_i32, %c0_i32_0 : i32, i32, i32
  }
  func.func @transform_9(%arg0: i32, %arg1: i32) -> (i32, i32, i32) {
    %c0_i32 = arith.constant 0 : i32
    %c0_i32_0 = arith.constant 0 : i32
    %c0_i32_1 = arith.constant 0 : i32
    return %arg1, %c0_i32, %c0_i32_0 : i32, i32, i32
  }
  func.func @transform_10(%arg0: i32, %arg1: i32) -> (i32, i32, i32) {
    %c0_i32 = arith.constant 0 : i32
    %c0_i32_0 = arith.constant 0 : i32
    %c0_i32_1 = arith.constant 0 : i32
    return %arg1, %c0_i32, %c0_i32_0 : i32, i32, i32
  }
  func.func @transform_11(%arg0: i32, %arg1: i32) -> (i32, i32, i32) {
    %c0_i32 = arith.constant 0 : i32
    %c0_i32_0 = arith.constant 0 : i32
    %c0_i32_1 = arith.constant 0 : i32
    return %arg1, %c0_i32, %c0_i32_0 : i32, i32, i32
  }
  func.func @transform_12(%arg0: i32, %arg1: i32) -> (i32, i32) {
    %c0_i32 = arith.constant 0 : i32
    %c0_i32_0 = arith.constant 0 : i32
    %c0_i32_1 = arith.constant 0 : i32
    return %c0_i32, %c0_i32_0 : i32, i32
  }
  func.func @transform_13(%arg0: i32, %arg1: i32) -> (i32, i32) {
    %c0_i32 = arith.constant 0 : i32
    %c0_i32_0 = arith.constant 0 : i32
    %c0_i32_1 = arith.constant 0 : i32
    return %c0_i32, %c0_i32_0 : i32, i32
  }
  func.func @transform_14(%arg0: i32, %arg1: i32) -> (i32, i32) {
    %c0_i32 = arith.constant 0 : i32
    %c0_i32_0 = arith.constant 0 : i32
    %c0_i32_1 = arith.constant 0 : i32
    return %c0_i32, %c0_i32_0 : i32, i32
  }
  func.func @transform_15(%arg0: i32, %arg1: i32) -> (i32, i32, i32) {
    %c0_i32 = arith.constant 0 : i32
    %c0_i32_0 = arith.constant 0 : i32
    %c0_i32_1 = arith.constant 0 : i32
    return %arg0, %c0_i32, %c0_i32_0 : i32, i32, i32
  }
}

</mosaic_0001>

<bundles_post_ra>
// kernel: classification_model_forward.1
= control target key start
LH: loop header
LB: loop body
LE: loop exit
PB: predicated region body
PF: predicated region fallthrough
CT: control target
= control target key end

     0   :  { %s2939_s18 = smov 0   ;;  %s2941_s19 = smov 0   ;;  %s3358_s0 = inlined_call_operand.vmem [shape: f32[2,8,32], index: 0, kind: input, shape index: {}]   ;;  %s3359_s1 = inlined_call_operand.vmem [shape: bf16[2,32,96], index: 1, kind: input, shape index: {}]   ;;  %s3360_s2 = inlined_call_operand.vmem [shape: bf16[2,32,32], index: 2, kind: input, shape index: {}]   ;;  %s3361_s3 = inlined_call_operand.vmem [shape: f32[2,1,32], index: 3, kind: input, shape index: {}]   ;;  %s3362_s4 = inlined_call_operand.vmem [shape: bf16[2,32,128], index: 4, kind: input, shape index: {}]   ;;  %s3363_s5 = inlined_call_operand.vmem [shape: f32[2,1,128], index: 5, kind: input, shape index: {}]   ;;  %s3364_s6 = inlined_call_operand.vmem [shape: bf16[2,128,32], index: 6, kind: input, shape index: {}]   ;;  %s3365_s7 = inlined_call_operand.vmem [shape: f32[2,1,32], index: 7, kind: input, shape index: {}]   ;;  %s3366_s8 = inlined_call_operand.vmem [shape: f32[2,1,32], index: 8, kind: input, shape index: {}]   ;;  %s3367_s9 = inlined_call_operand.vmem [shape: f32[2,1,32], index: 9, kind: input, shape index: {}]   ;;  %s3368_s10 = inlined_call_operand.vmem [shape: f32[2,1,32], index: 10, kind: input, shape index: {}]   ;;  %s3369_s11 = inlined_call_operand.vmem [shape: f32[2,1,32], index: 11, kind: input, shape index: {}]   ;;  %s3370_s12 = inlined_call_operand.vmem [shape: f32[1,32], index: 12, kind: input, shape index: {}]   ;;  %s3371_s13 = inlined_call_operand.vmem [shape: f32[1,32], index: 13, kind: input, shape index: {}]   ;;  %s3372_s14 = inlined_call_operand.vmem [shape: bf16[1,32], index: 14, kind: input, shape index: {}]   ;;  %s3373_s15 = inlined_call_operand.vmem [shape: f32[1,1,16], index: 15, kind: output, shape index: {}]  }
   0x1   :  { %3376 = sst [smem:[#allocation6_spill]] %s3359_s1  ;;  %s2943_s20 = smov 0  }
   0x2   :  { %3377 = sst [smem:[#allocation7_spill]] %s3360_s2 }
   0x3   :  { %3378 = sst [smem:[#allocation8_spill]] %s3362_s4 }
   0x4   :  { %3379 = sst [smem:[#allocation9_spill]] %s3370_s12 }
   0x5   :  { %3380 = sst [smem:[#allocation10_spill]] %s3371_s13 }
   0x6   :  { %3381 = sst [smem:[#allocation11_spill]] %s3372_s14 }
   0x7   :  { %3382 = sst [smem:[#allocation12_spill]] %s3373_s15 }
   0x8 LB: > { %3383 = sst [smem:[#allocation3_spill]] %s2835_s19  ;;  %s34_s21 = sadd.s32 1, %s2835_s19  ;;  %s2839_s20 = sphi %s2943_s20, %s25_s20   ;;  %s2835_s19 = sphi %s2941_s19, %s3399_s19   ;;  %s2831_s18 = sphi %s2939_s18, %s3398_s18  }
   0x9   : > { %3384 = sst [smem:[#allocation4_spill]] %s2839_s20  ;;  %p2409_p0 = scmp.ge.s32.totalorder %s2839_s20, 1 }
   0xa   : > { %p35_p1 = scmp.ge.s32.totalorder %s34_s21, 2  ;;  %p546_p2 = scmp.lt.s32.totalorder %s2839_s20, 3 }
   0xc   : > { %s3401_s21 = smov (%p35_p1, %s34_s21), 0  ;;  %p547_p3 = pnand %p2409_p0, %p546_p2 }
   0xd   : > { %3385 = sst [smem:[#allocation5_spill]] %s3401_s21  ;;  %p639_p4 = scmp.lt.s32.totalorder (!%p547_p3), %s2831_s18, 1 }
   0xe   : > { %550 = sbr.rel (%p547_p3) target bundleno = 4130 (0x1022), region = 80  ;;  %s3386_s1 = sld [smem:[#allocation6_spill]] (!%p547_p3) }
   0xf   : > { %s3387_s2 = sld [smem:[#allocation7_spill]] (!%p547_p3)  ;;  %s3388_s4 = sld [smem:[#allocation8_spill]] (!%p547_p3) }
  0x10   : > { %p2418_p5 = scmp.ne.s32.totalorder (!%p547_p3), %s2831_s18, 0 }
  0x15   : > { %s2961_s22 = scalar_select %p639_p4, %s2831_s18, 1 }
  0x16   : > { %687 = sbr.rel (%p2418_p5) target bundleno = 29 (0x1d), region = 84  ;;  %v688_v0 = vld [vmem:[%s3358_s0] sm:$0xff] (!%p2418_p5)  ;;  %vm690_vm0 = vcmask (!%p2418_p5), 261120   ;;  %v689_v1 = vld [vmem:[%s3358_s0 + $0x8] sm:$0xff] (!%p2418_p5) }
  0x17   : > { %s2466_s23 = sshll.u32 %s2961_s22, 4  ;;  %s2469_s25 = sshll.u32 %s2961_s22, 6  ;;  %691 = vst.msk [vmem:[#allocation2] sm:$0xff] (!%p2418_p5), %vm690_vm0, %v688_v0  ;;  %692 = vst.msk [vmem:[#allocation2 + $0x8] sm:$0xff] (!%p2418_p5), %vm690_vm0, %v689_v1 }
  0x18   : > { %s2971_s29 = scalar_lea.vmem %s3386_s1, %s2466_s23  ;;  %s2976_s17 = scalar_lea.vmem %s3387_s2, %s2466_s23 }
  0x19   : > { %s2981_s20 = scalar_lea.vmem %s3388_s4, %s2466_s23  ;;  %s667_s27 = scalar_lea.vmem %s3365_s7, %s2961_s22 }
  0x1a   : > { %s2995_s30 = scalar_lea.vmem %s3364_s6, %s2469_s25  ;;  %s670_s19 = scalar_lea.vmem %s3366_s8, %s2961_s22 }
  0x1b   : > { %s673_s4 = scalar_lea.vmem %s3367_s9, %s2961_s22  ;;  %s676_s24 = scalar_lea.vmem %s3368_s10, %s2961_s22 }
  0x1c   : > { %s679_s26 = scalar_lea.vmem %s3369_s11, %s2961_s22 }
  0x1d PF: > { %vm697_vm1 = vcmask 261120   ;;  %v2725_v16 = vld [vmem:[%s2971_s29] sm:$0xff]   ;;  %v2841_v17 = vmov 0.0   ;;  %vm2842_vm2 = vmmov 0   ;;  %v2726_v18 = vld [vmem:[%s2971_s29 + $0x8] sm:$0xff]   ;;  %vm826_vm7 = vcmask 64512  }
  0x1e   : > { %v693_v2 = vld [vmem:[#allocation2] sm:$0xff]  ;;  %v694_v3 = vld [vmem:[#allocation2 + $0x8] sm:$0xff]  ;;  %2522 = vmatprep.subr.bf16.mxu0 %v2841_v17  ;;  %2526 = vmatprep.mubr.msk.bf16.mxu0 %vm2842_vm2, %v2841_v17  ;;  %v816_v56 = vlaneseq  ;;  %s2845_s23 = smov 88   ;;  %s2846_s14 = smov 120   ;;  %vm961_vm9 = vcmask 1043456   ;;  %vm1787_vm10 = vcmask 130048  }
  0x1f   : > { %v698_v4 = vsel %vm697_vm1, %v693_v2, 0.0  ;;  %v701_v5 = vsel %vm697_vm1, %v694_v3, 0.0  ;;  %2523 = vmatpush3.bf16.msra.mxu0 %v2725_v16  ;;  %2542 = vmatprep.subr.bf16.mxu1 %v2841_v17  ;;  %v2419_v37 = vld [vmem:[%s670_s19] ss:$0 sm:$0xff]  ;;  %s2843_s19 = smov 96   ;;  %s2847_s15 = smov 56  }
  0x20   : > { %699 = vadd.xlane.f32.xlu0 %v698_v4  ;;  %2524 = vmatprep.subr.bf16.mxu0 %v2841_v17  ;;  %v2420_v41 = vld [vmem:[%s673_s4] ss:$0 sm:$0xff]  ;;  %v817_v57 = vshrl.u32 %v816_v56, 7  ;;  %v819_v58 = vand.u32 127, %v816_v56  ;;  %s2844_s4 = smov 64   ;;  %s2848_s13 = smov 80  }
  0x21   : > { %2544 = vmatprep.mubr.msk.bf16.mxu1 %vm2842_vm2, %v2841_v17  ;;  %s2849_s1 = smov 112   ;;  %s2850_s25 = smov 48   ;;  %vm1790_vm11 = vcmask 195584  }
  0x22   : > { %vm3065_vm8 = vcmp.le.s32.totalorder %v819_v58, %v817_v57  ;;  %s2851_s2 = smov 72   ;;  %s2852_s28 = smov 104  }
  0x23   : > { %2525 = vmatpush3.bf16.msra.mxu0 %v2726_v18  ;;  %s2853_s12 = smov 40   ;;  %s2854_s29 = smov 8  }
  0x24   : > { %702 = vadd.xlane.f32.xlu0 %v701_v5  ;;  %2530 = vmatprep.subr.bf16.mxu0 %v2841_v17  ;;  %s2855_s16 = smov 16   ;;  %s2856_s21 = smov 24  }
  0x25   : > { %p2459_p6 = scmp.ne.s32.totalorder %s2831_s18, 1 }
  0x26   : > { %vm2858_vm0 = vmmov (!%p2459_p6), 0  }
  0xad   : > { %v700_v6 = vpop.xlane.xlu0 %699 }
  0xae   : > { %v705_v7 = vmul.f32 0.03125, %v700_v6 }
  0xb0   : > { %v707_v8 = vsub.f32 %v693_v2, %v705_v7 }
  0xb1   : > { %v703_v9 = vpop.xlane.xlu0 %702 }
  0xb2   : > { %v706_v10 = vmul.f32 0.03125, %v703_v9  ;;  %v709_v11 = vmul.f32 %v707_v8, %v707_v8 }
  0xb4   : > { %v708_v12 = vsub.f32 %v694_v3, %v706_v10  ;;  %v711_v13 = vsel %vm697_vm1, %v709_v11, 0.0 }
  0xb5   : > { %712 = vadd.xlane.f32.xlu1 %v711_v13 }
  0xb6   : > { %v710_v14 = vmul.f32 %v708_v12, %v708_v12 }
  0xb8   : > { %v714_v15 = vsel %vm697_vm1, %v710_v14, 0.0 }
  0xb9   : > { %715 = vadd.xlane.f32.xlu1 %v714_v15 }
 0x142   : > { %v713_v19 = vpop.xlane.xlu1 %712 }
 0x143   : > { %v717_v20 = vmul.f32 0.03125, %v713_v19 }
 0x145   : > { %v719_v21 = vadd.f32 1e-05, %v717_v20 }
 0x146   : > { %v716_v22 = vpop.xlane.xlu1 %715 }
 0x147   : > { %2739 = vrsqrt.f32 %v719_v21  ;;  %v718_v23 = vmul.f32 0.03125, %v716_v22  ;;  %vm723_vm3 = vcmp.eq.f32.partialorder %v719_v21, inf  ;;  %v726_v27 = vand.u32 2147483648, %v719_v21 }
 0x148   : > { %vm725_vm4 = vcmp.eq.f32.partialorder %v719_v21, 0.0 }
 0x149   : > { %v720_v24 = vadd.f32 1e-05, %v718_v23 }
 0x14b   : > { %2741 = vrsqrt.f32 %v720_v24  ;;  %vm730_vm5 = vcmp.eq.f32.partialorder %v720_v24, inf  ;;  %v733_v32 = vand.u32 2147483648, %v720_v24  ;;  %vm732_vm6 = vcmp.eq.f32.partialorder %v720_v24, 0.0 }
 0x151   : > { %v2740_v25 = vpop.eup %2739 }
 0x152   : > { %v722_v26 = vmul.f32 %v2740_v25, %v719_v21 }
 0x154   : > { %v724_v28 = vsel %vm723_vm3, %v719_v21, %v722_v26 }
 0x155   : > { %v727_v29 = vsel %vm725_vm4, %v726_v27, %v724_v28  ;;  %v2742_v30 = vpop.eup %2741 }
 0x156   : > { %2743 = vrcp.f32 %v727_v29  ;;  %v729_v31 = vmul.f32 %v2742_v30, %v720_v24 }
 0x158   : > { %v731_v33 = vsel %vm730_vm5, %v720_v24, %v729_v31 }
 0x159   : > { %v734_v34 = vsel %vm732_vm6, %v733_v32, %v731_v33  ;;  %vm2236_vm6 = vcmask (!%p2459_p6), 122880  }
 0x15a   : > { %2745 = vrcp.f32 %v734_v34 }
 0x160   : > { %v2744_v35 = vpop.eup %2743 }
 0x161   : > { %v736_v36 = vmul.f32 %v2744_v35, %v707_v8 }
 0x163   : > { %v745_v40 = vmul.f32 %v2419_v37, %v736_v36 }
 0x164   : > { %v2746_v38 = vpop.eup %2745 }
 0x165   : > { %v738_v39 = vmul.f32 %v2746_v38, %v708_v12  ;;  %v753_v43 = vadd.f32 %v2420_v41, %v745_v40 }
 0x167   : > { %v746_v42 = vmul.f32 %v2419_v37, %v738_v39 }
 0x169   : > { %v754_v44 = vadd.f32 %v2420_v41, %v746_v42 }
 0x16b   : > { %v755_v45 = vpack.c.bf16 %v754_v44, %v753_v43 }
 0x16d   : > { %2527 = vmatmul.mubr.msk.bf16.vlgmr.msra.gmra.mrb[0].mxu0 %vm697_vm1, %v755_v45 }
 0x16e   : > { %2532 = vmatprep.mubr.msk.bf16.mxu0 %vm2842_vm2, %v2841_v17 }
 0x240   : > { %v809_v46 = vpop.f32.mrb[0].mxu0 }
 0x241   : > { %v3047_v47 = vpack.c.bf16 %v809_v46, %v809_v46  ;;  %v2528_v48 = vpop.f32.mrb[1].mxu0 }
 0x242   : > { %v812_v49 = vpop.f32.mrb[2].mxu0 }
 0x243   : > { %v3049_v50 = vpack.c.bf16 %v812_v49, %v812_v49  ;;  %824 = vrot.lane.b32.xlu0 %v3047_v47, %s2843_s19  ;;  %v2529_v51 = vpop.f32.mrb[3].mxu0 }
 0x245   : > { %874 = vrot.lane.b32.xlu1 %v3049_v50, %s2843_s19  ;;  %s3396_s19 = sld [smem:[#allocation12_spill]] (!%p2459_p6) }
 0x2b5   : > { %v825_v52 = vpop.permute.xlu0 %824 }
 0x2b6   : > { %v831_v53 = vsel %vm826_vm7, %v825_v52, 0 }
 0x2b7   : > { %2531 = vmatpush3.bf16.xpose.msra.mxu0 %v831_v53  ;;  %v875_v54 = vpop.permute.xlu1 %874 }
 0x2b8   : > { %2536 = vmatprep.subr.bf16.mxu0 %v2841_v17  ;;  %v880_v55 = vsel %vm826_vm7, %v875_v54, 0 }
 0x2be   : > { %2533 = vmatmul.mubr.msk.bf16.vlgmr.msra.gmra.mrb[4].mxu0 %vm826_vm7, %v3047_v47 }
 0x2bf   : > { %2537 = vmatpush3.bf16.xpose.msra.mxu0 %v880_v55  ;;  %2538 = vmatprep.mubr.msk.bf16.mxu0 %vm2842_vm2, %v2841_v17 }
 0x2c0   : > { %2548 = vmatprep.subr.bf16.mxu0 %v2841_v17 }
 0x2c6   : > { %2539 = vmatmul.mubr.msk.bf16.vlgmr.msra.gmra.mrb[8].mxu0 %vm826_vm7, %v3049_v50 }
 0x2c7   : > { %2550 = vmatprep.mubr.msk.bf16.mxu0 %vm2842_vm2, %v2841_v17 }
 0x391   : > { %v867_v60 = vpop.f32.mrb[4].mxu0 }
 0x392   : > { %v924_v61 = vsel %vm3065_vm8, %v867_v60, -inf  ;;  %v2534_v62 = vpop.f32.mrb[5].mxu0 }
 0x393   : > { %v870_v63 = vpop.f32.mrb[6].mxu0  ;;  %v926_v0 = vsel %vm826_vm7, %v924_v61, -inf }
 0x394   : > { %927 = vmax.xlane.f32.xlu1 %v926_v0  ;;  %v2535_v1 = vpop.f32.mrb[7].mxu0 }
 0x399   : > { %v916_v2 = vpop.f32.mrb[8].mxu0 }
 0x39a   : > { %v925_v3 = vsel %vm3065_vm8, %v916_v2, -inf  ;;  %v2540_v4 = vpop.f32.mrb[9].mxu0 }
 0x39b   : > { %v919_v5 = vpop.f32.mrb[10].mxu0  ;;  %v929_v6 = vsel %vm826_vm7, %v925_v3, -inf }
 0x39c   : > { %930 = vmax.xlane.f32.xlu0 %v929_v6  ;;  %v2541_v7 = vpop.f32.mrb[11].mxu0 }
 0x3a5   : > { %1005 = vrot.lane.b32.xlu1 %v3049_v50, %s2844_s4 }
 0x3a9   : > { %1061 = vrot.lane.b32.xlu1 %v3047_v47, %s2845_s23 }
 0x3ad   : > { %1111 = vrot.lane.b32.xlu1 %v3049_v50, %s2845_s23 }
 0x3b1   : > { %1109 = vrot.lane.b32.xlu1 %v3049_v50, %s2846_s14 }
 0x3b2   : > { %956 = vrot.lane.b32.xlu0 %v3047_v47, %s2844_s4  ;;  %s3391_s4 = scalar_lea.vmem %s3361_s3, %s2961_s22 }
 0x3b5   : > { %1239 = vrot.lane.b32.xlu1 %v3049_v50, %s2847_s15 }
 0x3b6   : > { %1059 = vrot.lane.b32.xlu0 %v3047_v47, %s2846_s14 }
 0x3ba   : > { %1191 = vrot.lane.b32.xlu0 %v3047_v47, %s2847_s15 }
 0x421   : > { %v928_v8 = vpop.xlane.xlu1 %927 }
 0x422   : > { %v938_v9 = vsub.f32 %v924_v61, %v928_v8  ;;  %v932_v33 = vsub.f32 -inf, %v928_v8 }
 0x424   : > { %v940_v10 = vmul.f32 1.442695, %v938_v9  ;;  %v934_v34 = vmul.f32 1.442695, %v932_v33 }
 0x425   : > { %v1006_v11 = vpop.permute.xlu1 %1005 }
 0x426   : > { %v1011_v12 = vsel %vm961_vm9, %v1006_v11, 0  ;;  %2747 = vpow2.f32 %v940_v10 }
 0x427   : > { %2549 = vmatpush3.bf16.msra.mxu0 %v1011_v12 }
 0x428   : > { %2560 = vmatprep.subr.bf16.mxu0 %v2841_v17 }
 0x429   : > { %v931_v13 = vpop.xlane.xlu0 %930  ;;  %v1062_v19 = vpop.permute.xlu1 %1061 }
 0x42a   : > { %v939_v14 = vsub.f32 %v925_v3, %v931_v13  ;;  %v1067_v24 = vsel %vm826_vm7, %v1062_v19, 0  ;;  %v933_v35 = vsub.f32 -inf, %v931_v13 }
 0x42c   : > { %v942_v15 = vmul.f32 1.442695, %v939_v14  ;;  %v936_v36 = vmul.f32 1.442695, %v933_v35 }
 0x42d   : > { %v957_v16 = vpop.permute.xlu0 %956  ;;  %v1112_v22 = vpop.permute.xlu1 %1111 }
 0x42e   : > { %v963_v18 = vsel %vm961_vm9, %v957_v16, 0  ;;  %2749 = vpow2.f32 %v942_v15  ;;  %v1117_v28 = vsel %vm826_vm7, %v1112_v22, 0 }
 0x42f   : > { %2543 = vmatpush3.bf16.msra.mxu1 %v963_v18  ;;  %2751 = vpow2.f32 %v934_v34 }
 0x430   : > { %2554 = vmatprep.subr.bf16.mxu1 %v2841_v17  ;;  %v3087_v20 = vpop.eup %2747  ;;  %2753 = vpow2.f32 %v936_v36 }
 0x431   : > { %v954_v21 = vpack.c.bf16 %v3087_v20, %v3087_v20  ;;  %v1060_v23 = vpop.permute.xlu0 %1059  ;;  %v1110_v27 = vpop.permute.xlu1 %1109 }
 0x433   : > { %2545 = vmatmul.mubr.msk.bf16.vlgmr.msra.gmra.mrb[0].mxu1 %vm826_vm7, %v954_v21 }
 0x434   : > { %2556 = vmatprep.mubr.msk.bf16.mxu1 %vm2842_vm2, %v2841_v17 }
 0x435   : > { %v1192_v29 = vpop.permute.xlu0 %1191  ;;  %v1240_v31 = vpop.permute.xlu1 %1239 }
 0x436   : > { %v1197_v30 = vsel %vm961_vm9, %v1192_v29, 0  ;;  %v1245_v32 = vsel %vm961_vm9, %v1240_v31, 0 }
 0x438   : > { %2555 = vmatpush3.bf16.xpose.msra.mxu1 %v1067_v24  ;;  %v3095_v25 = vpop.eup %2749 }
 0x439   : > { %2566 = vmatprep.subr.bf16.mxu1 %v2841_v17  ;;  %v955_v26 = vpack.c.bf16 %v3095_v25, %v3095_v25  ;;  %v2752_v37 = vpop.eup %2751 }
 0x43a   : > { %v3115_v38 = vmul.f32 0.0, %v2752_v37  ;;  %v2754_v44 = vpop.eup %2753 }
 0x43b   : > { %2551 = vmatmul.mubr.msk.bf16.vlgmr.msra.gmra.mrb[12].mxu0 %vm826_vm7, %v955_v26  ;;  %v3120_v45 = vmul.f32 0.0, %v2754_v44 }
 0x43c   : > { %2561 = vmatpush3.bf16.xpose.msra.mxu0 %v1117_v28  ;;  %2562 = vmatprep.mubr.msk.bf16.mxu0 %vm2842_vm2, %v2841_v17 }
 0x43d   : > { %2572 = vmatprep.subr.bf16.mxu0 %v2841_v17 }
 0x43f   : > { %2557 = vmatmul.mubr.msk.bf16.vlgmr.msra.gmra.mrb[4].mxu1 %vm826_vm7, %v1060_v23 }
 0x440   : > { %2567 = vmatpush3.bf16.msra.mxu1 %v1197_v30  ;;  %2568 = vmatprep.mubr.msk.bf16.mxu1 %vm2842_vm2, %v2841_v17 }
 0x441   : > { %2578 = vmatprep.subr.bf16.mxu1 %v2841_v17 }
 0x443   : > { %2563 = vmatmul.mubr.msk.bf16.vlgmr.msra.gmra.mrb[16].mxu0 %vm826_vm7, %v1110_v27 }
 0x444   : > { %2573 = vmatpush3.bf16.msra.mxu0 %v1245_v32  ;;  %2574 = vmatprep.mubr.msk.bf16.mxu0 %vm2842_vm2, %v2841_v17 }
 0x445   : > { %2584 = vmatprep.subr.bf16.mxu0 %v2841_v17 }
 0x506   : > { %v999_v39 = vpop.f32.mrb[0].mxu1 }
 0x507   : > { %v3118_v40 = vadd.f32 %v999_v39, %v3115_v38  ;;  %v2546_v41 = vpop.f32.mrb[1].mxu1 }
 0x508   : > { %v1002_v42 = vpop.f32.mrb[2].mxu1 }
 0x509   : > { %v2547_v43 = vpop.f32.mrb[3].mxu1 }
 0x50e   : > { %v1047_v46 = vpop.f32.mrb[12].mxu0 }
 0x50f   : > { %v3123_v48 = vadd.f32 %v1047_v46, %v3120_v45  ;;  %v2552_v49 = vpop.f32.mrb[13].mxu0 }
 0x510   : > { %v1050_v51 = vpop.f32.mrb[14].mxu0 }
 0x511   : > { %v2553_v52 = vpop.f32.mrb[15].mxu0 }
 0x512   : > { %v1103_v53 = vpop.f32.mrb[4].mxu1 }
 0x513   : > { %v1159_v54 = vsel %vm3065_vm8, %v1103_v53, -inf  ;;  %v2558_v55 = vpop.f32.mrb[5].mxu1 }
 0x514   : > { %v1106_v56 = vpop.f32.mrb[6].mxu1  ;;  %v1161_v57 = vsel %vm826_vm7, %v1159_v54, -inf }
 0x515   : > { %1162 = vmax.xlane.f32.xlu0 %v1161_v57  ;;  %v2559_v58 = vpop.f32.mrb[7].mxu1 }
 0x516   : > { %v1153_v60 = vpop.f32.mrb[16].mxu0 }
 0x517   : > { %v1160_v61 = vsel %vm3065_vm8, %v1153_v60, -inf  ;;  %v2564_v62 = vpop.f32.mrb[17].mxu0 }
 0x518   : > { %v1156_v63 = vpop.f32.mrb[18].mxu0  ;;  %v1164_v0 = vsel %vm826_vm7, %v1160_v61, -inf }
 0x519   : > { %1165 = vmax.xlane.f32.xlu1 %v1164_v0  ;;  %v2565_v1 = vpop.f32.mrb[19].mxu0 }
 0x52a   : > { %1345 = vrot.lane.b32.xlu1 %v3049_v50, %s2848_s13 }
 0x52b   : > { %1295 = vrot.lane.b32.xlu0 %v3047_v47, %s2848_s13  ;;  %s3392_s13 = scalar_lea.vmem %s3363_s5, %s2961_s22 }
 0x52e   : > { %1343 = vrot.lane.b32.xlu1 %v3049_v50, %s2849_s1 }
 0x52f   : > { %1293 = vrot.lane.b32.xlu0 %v3047_v47, %s2849_s1 }
 0x532   : > { %1473 = vrot.lane.b32.xlu1 %v3049_v50, %s2850_s25 }
 0x533   : > { %1425 = vrot.lane.b32.xlu0 %v3047_v47, %s2850_s25 }
 0x5a2   : > { %v1163_v2 = vpop.xlane.xlu0 %1162 }
 0x5a3   : > { %v1173_v3 = vsub.f32 %v1159_v54, %v1163_v2  ;;  %v1167_v24 = vsub.f32 -inf, %v1163_v2 }
 0x5a5   : > { %v1175_v4 = vmul.f32 1.442695, %v1173_v3  ;;  %v1169_v26 = vmul.f32 1.442695, %v1167_v24 }
 0x5a6   : > { %v1166_v5 = vpop.xlane.xlu1 %1165  ;;  %v1296_v8 = vpop.permute.xlu0 %1295 }
 0x5a7   : > { %2755 = vpow2.f32 %v1175_v4  ;;  %v1174_v6 = vsub.f32 %v1160_v61, %v1166_v5  ;;  %v1301_v13 = vsel %vm826_vm7, %v1296_v8, 0  ;;  %v1168_v27 = vsub.f32 -inf, %v1166_v5 }
 0x5a9   : > { %v1177_v7 = vmul.f32 1.442695, %v1174_v6  ;;  %v1171_v28 = vmul.f32 1.442695, %v1168_v27 }
 0x5aa   : > { %v1346_v10 = vpop.permute.xlu1 %1345  ;;  %v1294_v12 = vpop.permute.xlu0 %1293 }
 0x5ab   : > { %2757 = vpow2.f32 %v1177_v7  ;;  %v1351_v18 = vsel %vm826_vm7, %v1346_v10, 0 }
 0x5ac   : > { %2759 = vpow2.f32 %v1169_v26 }
 0x5ad   : > { %2761 = vpow2.f32 %v1171_v28 }
 0x5ae   : > { %v1344_v16 = vpop.permute.xlu1 %1343  ;;  %v1426_v19 = vpop.permute.xlu0 %1425 }
 0x5af   : > { %v1431_v21 = vsel %vm961_vm9, %v1426_v19, 0 }
 0x5b1   : > { %v3137_v9 = vpop.eup %2755 }
 0x5b2   : > { %v1189_v11 = vpack.c.bf16 %v3137_v9, %v3137_v9  ;;  %v1474_v22 = vpop.permute.xlu1 %1473 }
 0x5b3   : > { %v1479_v23 = vsel %vm961_vm9, %v1474_v22, 0 }
 0x5b4   : > { %2569 = vmatmul.mubr.msk.bf16.vlgmr.msra.gmra.mrb[8].mxu1 %vm826_vm7, %v1189_v11 }
 0x5b5   : > { %2579 = vmatpush3.bf16.xpose.msra.mxu1 %v1301_v13  ;;  %2580 = vmatprep.mubr.msk.bf16.mxu1 %vm2842_vm2, %v2841_v17  ;;  %v3145_v14 = vpop.eup %2757 }
 0x5b6   : > { %2590 = vmatprep.subr.bf16.mxu1 %v2841_v17  ;;  %v1190_v15 = vpack.c.bf16 %v3145_v14, %v3145_v14  ;;  %v2760_v29 = vpop.eup %2759  ;;  %v1184_v59 = vsel %vm826_vm7, %v3145_v14, 0.0 }
 0x5b7   : > { %v3165_v30 = vmul.f32 0.0, %v2760_v29  ;;  %v2762_v32 = vpop.eup %2761 }
 0x5b8   : > { %2575 = vmatmul.mubr.msk.bf16.vlgmr.msra.gmra.mrb[20].mxu0 %vm826_vm7, %v1190_v15  ;;  %v3170_v37 = vmul.f32 0.0, %v2762_v32 }
 0x5b9   : > { %2585 = vmatpush3.bf16.xpose.msra.mxu0 %v1351_v18  ;;  %2586 = vmatprep.mubr.msk.bf16.mxu0 %vm2842_vm2, %v2841_v17 }
 0x5ba   : > { %2596 = vmatprep.subr.bf16.mxu0 %v2841_v17 }
 0x5bc   : > { %2581 = vmatmul.mubr.msk.bf16.vlgmr.msra.gmra.mrb[12].mxu1 %vm826_vm7, %v1294_v12 }
 0x5bd   : > { %2591 = vmatpush3.bf16.msra.mxu1 %v1431_v21  ;;  %2592 = vmatprep.mubr.msk.bf16.mxu1 %vm2842_vm2, %v2841_v17 }
 0x5be   : > { %2602 = vmatprep.subr.bf16.mxu1 %v2841_v17 }
 0x5c0   : > { %2587 = vmatmul.mubr.msk.bf16.vlgmr.msra.gmra.mrb[24].mxu0 %vm826_vm7, %v1344_v16 }
 0x5c1   : > { %2597 = vmatpush3.bf16.msra.mxu0 %v1479_v23  ;;  %2598 = vmatprep.mubr.msk.bf16.mxu0 %vm2842_vm2, %v2841_v17 }
 0x5c2   : > { %2608 = vmatprep.subr.bf16.mxu0 %v2841_v17 }
 0x687   : > { %v1233_v31 = vpop.f32.mrb[8].mxu1 }
 0x688   : > { %v3168_v33 = vadd.f32 %v1233_v31, %v3165_v30  ;;  %v2570_v34 = vpop.f32.mrb[9].mxu1 }
 0x689   : > { %v1236_v35 = vpop.f32.mrb[10].mxu1 }
 0x68a   : > { %v2571_v36 = vpop.f32.mrb[11].mxu1 }
 0x68b   : > { %v1281_v39 = vpop.f32.mrb[20].mxu0 }
 0x68c   : > { %v3173_v41 = vadd.f32 %v1281_v39, %v3170_v37  ;;  %v2576_v42 = vpop.f32.mrb[21].mxu0 }
 0x68d   : > { %v1284_v43 = vpop.f32.mrb[22].mxu0 }
 0x68e   : > { %v2577_v44 = vpop.f32.mrb[23].mxu0 }
 0x68f   : > { %v1337_v46 = vpop.f32.mrb[12].mxu1 }
 0x690   : > { %v1393_v49 = vsel %vm3065_vm8, %v1337_v46, -inf  ;;  %v2582_v51 = vpop.f32.mrb[13].mxu1 }
 0x691   : > { %v1340_v52 = vpop.f32.mrb[14].mxu1  ;;  %v1395_v53 = vsel %vm826_vm7, %v1393_v49, -inf }
 0x692   : > { %1396 = vmax.xlane.f32.xlu0 %v1395_v53  ;;  %v2583_v54 = vpop.f32.mrb[15].mxu1 }
 0x693   : > { %v1387_v55 = vpop.f32.mrb[24].mxu0 }
 0x694   : > { %v1394_v56 = vsel %vm3065_vm8, %v1387_v55, -inf  ;;  %v2588_v57 = vpop.f32.mrb[25].mxu0 }
 0x695   : > { %v1390_v58 = vpop.f32.mrb[26].mxu0  ;;  %v1398_v60 = vsel %vm826_vm7, %v1394_v56, -inf }
 0x696   : > { %1399 = vmax.xlane.f32.xlu1 %v1398_v60  ;;  %v2589_v61 = vpop.f32.mrb[27].mxu0  ;;  %v1181_v60 = vsel %vm826_vm7, %v3137_v9, 0.0 }
 0x6a7   : > { %1579 = vrot.lane.b32.xlu1 %v3049_v50, %s2851_s2 }
 0x6a8   : > { %1529 = vrot.lane.b32.xlu0 %v3047_v47, %s2851_s2 }
 0x6ab   : > { %1577 = vrot.lane.b32.xlu1 %v3049_v50, %s2852_s28 }
 0x6ac   : > { %1527 = vrot.lane.b32.xlu0 %v3047_v47, %s2852_s28  ;;  %s3394_s28 = sld [smem:[#allocation10_spill]] (!%p2459_p6) }
 0x71f   : > { %v1397_v62 = vpop.xlane.xlu0 %1396 }
 0x720   : > { %v1407_v63 = vsub.f32 %v1393_v49, %v1397_v62  ;;  %v1401_v16 = vsub.f32 -inf, %v1397_v62 }
 0x722   : > { %v1409_v0 = vmul.f32 1.442695, %v1407_v63  ;;  %v1403_v18 = vmul.f32 1.442695, %v1401_v16 }
 0x723   : > { %v1400_v1 = vpop.xlane.xlu1 %1399  ;;  %v1530_v5 = vpop.permute.xlu0 %1529 }
 0x724   : > { %2763 = vpow2.f32 %v1409_v0  ;;  %v1408_v2 = vsub.f32 %v1394_v56, %v1400_v1  ;;  %v1535_v7 = vsel %vm826_vm7, %v1530_v5, 0  ;;  %v1402_v19 = vsub.f32 -inf, %v1400_v1 }
 0x726   : > { %v1411_v3 = vmul.f32 1.442695, %v1408_v2  ;;  %v1405_v21 = vmul.f32 1.442695, %v1402_v19 }
 0x727   : > { %v1580_v10 = vpop.permute.xlu1 %1579  ;;  %v1528_v13 = vpop.permute.xlu0 %1527 }
 0x728   : > { %2765 = vpow2.f32 %v1411_v3  ;;  %v1585_v12 = vsel %vm826_vm7, %v1580_v10, 0  ;;  %v946_v10 = vsel %vm826_vm7, %v3087_v20, 0.0 }
 0x729   : > { %2767 = vpow2.f32 %v1403_v18 }
 0x72a   : > { %2769 = vpow2.f32 %v1405_v21 }
 0x72b   : > { %v1578_v15 = vpop.permute.xlu1 %1577 }
 0x72e   : > { %v2764_v4 = vpop.eup %2763 }
 0x72f   : > { %v1423_v6 = vpack.c.bf16 %v2764_v4, %v2764_v4  ;;  %v1415_v61 = vsel %vm826_vm7, %v2764_v4, 0.0 }
 0x731   : > { %2593 = vmatmul.mubr.msk.bf16.vlgmr.msra.gmra.mrb[16].mxu1 %vm826_vm7, %v1423_v6 }
 0x732   : > { %2603 = vmatpush3.bf16.xpose.msra.mxu1 %v1535_v7  ;;  %2604 = vmatprep.mubr.msk.bf16.mxu1 %vm2842_vm2, %v2841_v17  ;;  %v2766_v8 = vpop.eup %2765 }
 0x733   : > { %2614 = vmatprep.subr.bf16.mxu1 %v2841_v17  ;;  %v1424_v11 = vpack.c.bf16 %v2766_v8, %v2766_v8  ;;  %v2768_v22 = vpop.eup %2767  ;;  %v1418_v62 = vsel %vm826_vm7, %v2766_v8, 0.0 }
 0x734   : > { %v3201_v23 = vmul.f32 0.0, %v2768_v22  ;;  %v2770_v26 = vpop.eup %2769 }
 0x735   : > { %2599 = vmatmul.mubr.msk.bf16.vlgmr.msra.gmra.mrb[28].mxu0 %vm826_vm7, %v1424_v11  ;;  %v3206_v32 = vmul.f32 0.0, %v2770_v26 }
 0x736   : > { %2609 = vmatpush3.bf16.xpose.msra.mxu0 %v1585_v12  ;;  %2610 = vmatprep.mubr.msk.bf16.mxu0 %vm2842_vm2, %v2841_v17 }
 0x737   : > { %2620 = vmatprep.subr.bf16.mxu0 %v2841_v17 }
 0x739   : > { %2605 = vmatmul.mubr.msk.bf16.vlgmr.msra.gmra.mrb[20].mxu1 %vm826_vm7, %v1528_v13  ;;  %v949_v13 = vsel %vm826_vm7, %v3095_v25, 0.0 }
 0x73a   : > { %2616 = vmatprep.mubr.msk.bf16.mxu1 %vm2842_vm2, %v2841_v17 }
 0x73d   : > { %2611 = vmatmul.mubr.msk.bf16.vlgmr.msra.gmra.mrb[32].mxu0 %vm826_vm7, %v1578_v15 }
 0x73e   : > { %2622 = vmatprep.mubr.msk.bf16.mxu0 %vm2842_vm2, %v2841_v17 }
 0x804   : > { %v1467_v24 = vpop.f32.mrb[16].mxu1 }
 0x805   : > { %v3204_v27 = vadd.f32 %v1467_v24, %v3201_v23  ;;  %v2594_v28 = vpop.f32.mrb[17].mxu1 }
 0x806   : > { %v1470_v29 = vpop.f32.mrb[18].mxu1 }
 0x807   : > { %v2595_v31 = vpop.f32.mrb[19].mxu1 }
 0x808   : > { %v1515_v34 = vpop.f32.mrb[28].mxu0 }
 0x809   : > { %v3209_v35 = vadd.f32 %v1515_v34, %v3206_v32  ;;  %v2600_v36 = vpop.f32.mrb[29].mxu0 }
 0x80a   : > { %v1518_v39 = vpop.f32.mrb[30].mxu0 }
 0x80b   : > { %v2601_v42 = vpop.f32.mrb[31].mxu0 }
 0x80c   : > { %v1571_v43 = vpop.f32.mrb[20].mxu1 }
 0x80d   : > { %v1627_v44 = vsel %vm3065_vm8, %v1571_v43, -inf  ;;  %v2606_v46 = vpop.f32.mrb[21].mxu1 }
 0x80e   : > { %v1574_v49 = vpop.f32.mrb[22].mxu1  ;;  %v1629_v51 = vsel %vm826_vm7, %v1627_v44, -inf }
 0x80f   : > { %1630 = vmax.xlane.f32.xlu0 %v1629_v51  ;;  %v2607_v52 = vpop.f32.mrb[23].mxu1 }
 0x810   : > { %v1621_v53 = vpop.f32.mrb[32].mxu0 }
 0x811   : > { %v1628_v54 = vsel %vm3065_vm8, %v1621_v53, -inf  ;;  %v2612_v55 = vpop.f32.mrb[33].mxu0 }
 0x812   : > { %v1624_v56 = vpop.f32.mrb[34].mxu0  ;;  %v1632_v57 = vsel %vm826_vm7, %v1628_v54, -inf }
 0x813   : > { %1633 = vmax.xlane.f32.xlu1 %v1632_v57  ;;  %v2613_v58 = vpop.f32.mrb[35].mxu0 }
 0x824   : > { %1707 = vrot.lane.b32.xlu1 %v3049_v50, %s2853_s12 }
 0x825   : > { %1659 = vrot.lane.b32.xlu0 %v3047_v47, %s2853_s12 }
 0x844   : > { %1182 = vadd.xlane.f32.xlu0 %v1181_v60 }
 0x848   : > { %1416 = vadd.xlane.f32.xlu0 %v1415_v61  ;;  %1185 = vadd.xlane.f32.xlu1 %v1184_v59 }
 0x84c   : > { %1419 = vadd.xlane.f32.xlu0 %v1418_v62 }
 0x89c   : > { %v3225_v63 = vpop.xlane.xlu0 %1630 }
 0x89d   : > { %v1641_v50 = vsub.f32 %v1627_v44, %v3225_v63  ;;  %v1635_v51 = vsub.f32 -inf, %v3225_v63 }
 0x89f   : > { %v1643_v0 = vmul.f32 1.442695, %v1641_v50  ;;  %v1637_v52 = vmul.f32 1.442695, %v1635_v51 }
 0x8a0   : > { %v1660_v47 = vpop.permute.xlu0 %1659  ;;  %v3229_v9 = vpop.xlane.xlu1 %1633 }
 0x8a1   : > { %v1665_v1 = vsel %vm961_vm9, %v1660_v47, 0  ;;  %2771 = vpow2.f32 %v1643_v0  ;;  %v1642_v2 = vsub.f32 %v1628_v54, %v3229_v9  ;;  %v1636_v53 = vsub.f32 -inf, %v3229_v9 }
 0x8a2   : > { %2615 = vmatpush3.bf16.msra.mxu1 %v1665_v1 }
 0x8a3   : > { %2626 = vmatprep.subr.bf16.mxu1 %v2841_v17  ;;  %v1645_v14 = vmul.f32 1.442695, %v1642_v2 }
 0x8a4   : > { %v1708_v3 = vpop.permute.xlu1 %1707 }
 0x8a5   : > { %v1713_v4 = vsel %vm961_vm9, %v1708_v3, 0  ;;  %2773 = vpow2.f32 %v1645_v14 }
 0x8a6   : > { %2621 = vmatpush3.bf16.msra.mxu0 %v1713_v4 }
 0x8a7   : > { %2634 = vmatprep.subr.bf16.mxu0 %v2841_v17 }
 0x8ab   : > { %v2772_v5 = vpop.eup %2771 }
 0x8ac   : > { %v1649_v6 = vsel %vm826_vm7, %v2772_v5, 0.0  ;;  %v1657_v7 = vpack.c.bf16 %v2772_v5, %v2772_v5 }
 0x8ad   : > { %1650 = vadd.xlane.f32.xlu0 %v1649_v6 }
 0x8ae   : > { %2617 = vmatmul.mubr.msk.bf16.vlgmr.msra.gmra.mrb[24].mxu1 %vm826_vm7, %v1657_v7 }
 0x8af   : > { %2630 = vmatprep.mubr.msk.bf16.mxu1 %vm2842_vm2, %v2841_v17  ;;  %v2774_v8 = vpop.eup %2773 }
 0x8b0   : > { %v1652_v11 = vsel %vm826_vm7, %v2774_v8, 0.0  ;;  %v1658_v12 = vpack.c.bf16 %v2774_v8, %v2774_v8 }
 0x8b1   : > { %947 = vadd.xlane.f32.xlu0 %v946_v10  ;;  %1653 = vadd.xlane.f32.xlu1 %v1652_v11 }
 0x8b2   : > { %2623 = vmatmul.mubr.msk.bf16.vlgmr.msra.gmra.mrb[36].mxu0 %vm826_vm7, %v1658_v12 }
 0x8b3   : > { %2638 = vmatprep.mubr.msk.bf16.mxu0 %vm2842_vm2, %v2841_v17 }
 0x8b5   : > { %950 = vadd.xlane.f32.xlu1 %v949_v13 }
 0x8d1   : > { %v1183_v15 = vpop.xlane.xlu0 %1182 }
 0x8d2   : > { %v1187_v16 = vadd.f32 %v1183_v15, %v3165_v30 }
 0x8d4   : > { %2775 = vrcp.f32 %v1187_v16 }
 0x8d5   : > { %v1417_v18 = vpop.xlane.xlu0 %1416  ;;  %v1186_v19 = vpop.xlane.xlu1 %1185 }
 0x8d6   : > { %v1421_v20 = vadd.f32 %v1417_v18, %v3201_v23  ;;  %v1188_v21 = vadd.f32 %v1186_v19, %v3170_v37 }
 0x8d8   : > { %2777 = vrcp.f32 %v1421_v20 }
 0x8d9   : > { %2779 = vrcp.f32 %v1188_v21  ;;  %v1420_v22 = vpop.xlane.xlu0 %1419 }
 0x8da   : > { %v1422_v24 = vadd.f32 %v1420_v22, %v3206_v32  ;;  %v2727_v32 = vld [vmem:[%s2976_s17] sm:$0xff]  }
 0x8db   : > { %2627 = vmatpush3.bf16.msra.mxu1 %v2727_v32 }
 0x8dc   : > { %2781 = vrcp.f32 %v1422_v24  ;;  %2628 = vmatprep.subr.bf16.mxu1 %v2841_v17 }
 0x8de   : > { %v2776_v26 = vpop.eup %2775 }
 0x8df   : > { %v1291_v25 = vmul.f32 %v2776_v26, %v3168_v33 }
 0x8e2   : > { %v2778_v28 = vpop.eup %2777 }
 0x8e3   : > { %v2780_v29 = vpop.eup %2779  ;;  %v1525_v30 = vmul.f32 %v2778_v28, %v3204_v27  ;;  %v2807_v28 = vld [vmem:[#allocation2] sm:$0xff] }
 0x8e4   : > { %v1292_v31 = vmul.f32 %v2780_v29, %v3173_v41 }
 0x8e6   : > { %v2782_v23 = vpop.eup %2781  ;;  %v2710_v34 = vpack.i.bf16 %v1292_v31, %v1291_v25  ;;  %v2443_v25 = vld [vmem:[%s3391_s4] ss:$0 sm:$0xff] }
 0x8e7   : > { %v1526_v37 = vmul.f32 %v2782_v23, %v3209_v35 }
 0x8e8   : > { %2711 = vrot.lane.b32.xlu0 %v2710_v34, %s2854_s29  ;;  %v2808_v34 = vld [vmem:[#allocation2 + $0x8] sm:$0xff] }
 0x8e9   : > { %v2715_v36 = vpack.i.bf16 %v1526_v37, %v1525_v30 }
 0x8eb   : > { %2716 = vrot.lane.b32.xlu1 %v2715_v36, %s2855_s16  ;;  %s3395_s16 = sld [smem:[#allocation11_spill]] (!%p2459_p6) }
 0x93a   : > { %v1651_v33 = vpop.xlane.xlu0 %1650 }
 0x93e   : > { %v948_v39 = vpop.xlane.xlu0 %947  ;;  %v1654_v27 = vpop.xlane.xlu1 %1653 }
 0x93f   : > { %v952_v42 = vadd.f32 %v948_v39, %v3115_v38  ;;  %v1639_v38 = vmul.f32 1.442695, %v1636_v53  ;;  %v2729_v53 = vld [vmem:[%s2981_s20] sm:$0xff]  }
 0x940   : > { %2635 = vmatpush3.bf16.msra.mxu0 %v2729_v53 }
 0x941   : > { %2783 = vrcp.f32 %v952_v42  ;;  %2636 = vmatprep.subr.bf16.mxu0 %v2841_v17 }
 0x942   : > { %v951_v41 = vpop.xlane.xlu1 %950 }
 0x943   : > { %v953_v43 = vadd.f32 %v951_v41, %v3120_v45 }
 0x945   : > { %2785 = vrcp.f32 %v953_v43 }
 0x946   : > { %2787 = vpow2.f32 %v1637_v52 }
 0x947   : > { %2789 = vpow2.f32 %v1639_v38  ;;  %v2730_v38 = vld [vmem:[%s2981_s20 + $0x8] sm:$0xff]  }
 0x948   : > { %2637 = vmatpush3.bf16.msra.mxu0 %v2730_v38  ;;  %v2450_v38 = vld [vmem:[%s667_s27] ss:$0 sm:$0xff]  ;;  %s3393_s27 = sld [smem:[#allocation9_spill]] (!%p2459_p6) }
 0x94b   : > { %v2784_v35 = vpop.eup %2783 }
 0x94c   : > { %v1057_v44 = vmul.f32 %v2784_v35, %v3118_v40  ;;  %v2728_v40 = vld [vmem:[%s2976_s17 + $0x8] sm:$0xff]  }
 0x94d   : > { %2629 = vmatpush3.bf16.msra.mxu1 %v2728_v40 }
 0x94e   : > { %2642 = vmatprep.subr.bf16.mxu1 %v2841_v17 }
 0x94f   : > { %v2786_v46 = vpop.eup %2785 }
 0x950   : > { %v1058_v49 = vmul.f32 %v2786_v46, %v3123_v48  ;;  %v2788_v54 = vpop.eup %2787 }
 0x951   : > { %v1647_v55 = vmul.f32 0.0, %v2788_v54  ;;  %v2790_v56 = vpop.eup %2789 }
 0x952   : > { %v1648_v57 = vmul.f32 0.0, %v2790_v56 }
 0x953   : > { %v1655_v45 = vadd.f32 %v1651_v33, %v1647_v55 }
 0x954   : > { %v1656_v58 = vadd.f32 %v1654_v27, %v1648_v57 }
 0x955   : > { %2791 = vrcp.f32 %v1655_v45 }
 0x956   : > { %2793 = vrcp.f32 %v1656_v58 }
 0x95a   : > { %v2712_v5 = vpop.permute.xlu0 %2711 }
 0x95b   : > { %v2714_v7 = vunpack.i.h.bf16 %v2712_v5  ;;  %v2713_v8 = vunpack.i.l.bf16 %v2712_v5  ;;  %v2445_v5 = vld [vmem:[%s679_s26] ss:$0 sm:$0xff] }
 0x95d   : > { %v2717_v6 = vpop.permute.xlu1 %2716  ;;  %v1785_v13 = vsel %vm826_vm7, %v1057_v44, %v2713_v8  ;;  %v1786_v15 = vsel %vm826_vm7, %v1058_v49, %v2714_v7 }
 0x95e   : > { %v2719_v10 = vunpack.i.h.bf16 %v2717_v6  ;;  %v2718_v11 = vunpack.i.l.bf16 %v2717_v6 }
 0x95f   : > { %v2792_v59 = vpop.eup %2791 }
 0x960   : > { %v2794_v9 = vpop.eup %2793  ;;  %v1789_v20 = vsel %vm1787_vm10, %v1786_v15, %v2719_v10  ;;  %v1788_v19 = vsel %vm1787_vm10, %v1785_v13, %v2718_v11  ;;  %v2731_v11 = vld [vmem:[%s2995_s30] sm:$0xff]   ;;  %v2733_v13 = vld [vmem:[%s2995_s30 + $0x10] sm:$0xff]   ;;  %v2734_v15 = vld [vmem:[%s2995_s30 + $0x18] sm:$0xff]  }
 0x981   : > { %v1701_v60 = vpop.f32.mrb[24].mxu1 }
 0x982   : > { %v1755_v61 = vadd.f32 %v1701_v60, %v1647_v55  ;;  %v2618_v48 = vpop.f32.mrb[25].mxu1 }
 0x983   : > { %v1704_v62 = vpop.f32.mrb[26].mxu1 }
 0x984   : > { %v1759_v63 = vmul.f32 %v2792_v59, %v1755_v61  ;;  %v2619_v50 = vpop.f32.mrb[27].mxu1 }
 0x985   : > { %v1749_v0 = vpop.f32.mrb[36].mxu0 }
 0x986   : > { %v1756_v47 = vadd.f32 %v1749_v0, %v1648_v57  ;;  %v2624_v1 = vpop.f32.mrb[37].mxu0 }
 0x987   : > { %v1752_v2 = vpop.f32.mrb[38].mxu0 }
 0x988   : > { %v1760_v14 = vmul.f32 %v2794_v9, %v1756_v47  ;;  %v2625_v3 = vpop.f32.mrb[39].mxu0  ;;  %v2444_v2 = vld [vmem:[%s676_s24] ss:$0 sm:$0xff] }
 0x98a   : > { %v2720_v4 = vpack.i.bf16 %v1760_v14, %v1759_v63 }
 0x98c   : > { %2721 = vrot.lane.b32.xlu1 %v2720_v4, %s2856_s21 }
 0x9fe   : > { %v2722_v12 = vpop.permute.xlu1 %2721 }
 0x9ff   : > { %v2724_v16 = vunpack.i.h.bf16 %v2722_v12  ;;  %v2723_v18 = vunpack.i.l.bf16 %v2722_v12  ;;  %v2732_v12 = vld [vmem:[%s2995_s30 + $0x8] sm:$0xff]  }
 0xa01   : > { %v1792_v21 = vsel %vm1790_vm11, %v1789_v20, %v2724_v16  ;;  %v1791_v22 = vsel %vm1790_vm11, %v1788_v19, %v2723_v18  ;;  %v2735_v16 = vld [vmem:[%s2995_s30 + $0x20] sm:$0xff]   ;;  %v2736_v18 = vld [vmem:[%s2995_s30 + $0x28] sm:$0xff]   ;;  %v2737_v20 = vld [vmem:[%s2995_s30 + $0x30] sm:$0xff]  }
 0xa02   : > { %v1793_v24 = vpack.c.bf16 %v1792_v21, %v1791_v22  ;;  %v2738_v19 = vld [vmem:[%s2995_s30 + $0x38] sm:$0xff]   ;;  %v2446_v21 = vld [vmem:[%s3392_s13] ss:$0 sm:$0xff] }
 0xa04   : > { %2631 = vmatmul.mubr.msk.bf16.vlgmr.msra.gmra.mrb[28].mxu1 %vm697_vm1, %v1793_v24 }
 0xa05   : > { %2658 = vmatprep.mubr.msk.bf16.mxu1 %vm2842_vm2, %v2841_v17  ;;  %2643 = vmatpush3.bf16.msra.mxu1 %v2731_v11 }
 0xa06   : > { %2644 = vmatprep.subr.bf16.mxu1 %v2841_v17 }
 0xa09   : > { %2645 = vmatpush3.bf16.msra.mxu1 %v2732_v12 }
 0xa0a   : > { %2646 = vmatprep.subr.bf16.mxu1 %v2841_v17 }
 0xa0d   : > { %2647 = vmatpush3.bf16.msra.mxu1 %v2733_v13 }
 0xa0e   : > { %2648 = vmatprep.subr.bf16.mxu1 %v2841_v17 }
 0xa11   : > { %2649 = vmatpush3.bf16.msra.mxu1 %v2734_v15 }
 0xa12   : > { %2650 = vmatprep.subr.bf16.mxu1 %v2841_v17 }
 0xa15   : > { %2651 = vmatpush3.bf16.msra.mxu1 %v2735_v16 }
 0xa16   : > { %2652 = vmatprep.subr.bf16.mxu1 %v2841_v17 }
 0xa19   : > { %2653 = vmatpush3.bf16.msra.mxu1 %v2736_v18 }
 0xa1a   : > { %2654 = vmatprep.subr.bf16.mxu1 %v2841_v17 }
 0xa1d   : > { %2655 = vmatpush3.bf16.msra.mxu1 %v2737_v20 }
 0xa1e   : > { %2656 = vmatprep.subr.bf16.mxu1 %v2841_v17 }
 0xa21   : > { %2657 = vmatpush3.bf16.msra.mxu1 %v2738_v19 }
 0xad7   : > { %v1847_v26 = vpop.f32.mrb[28].mxu1 }
 0xad8   : > { %v1854_v29 = vadd.f32 %v2807_v28, %v1847_v26  ;;  %v2632_v30 = vpop.f32.mrb[29].mxu1 }
 0xad9   : > { %v1850_v31 = vpop.f32.mrb[30].mxu1 }
 0xada   : > { %v3275_v23 = vadd.f32 %v2443_v25, %v1854_v29  ;;  %v1855_v37 = vadd.f32 %v2808_v34, %v1850_v31  ;;  %v2633_v36 = vpop.f32.mrb[31].mxu1 }
 0xadc   : > { %v3277_v32 = vadd.f32 %v2443_v25, %v1855_v37  ;;  %v1867_v33 = vsel %vm697_vm1, %v3275_v23, 0.0 }
 0xadd   : > { %1868 = vadd.xlane.f32.xlu1 %v1867_v33 }
 0xade   : > { %v1870_v39 = vsel %vm697_vm1, %v3277_v32, 0.0 }
 0xadf   : > { %1871 = vadd.xlane.f32.xlu0 %v1870_v39 }
 0xb6a   : > { %v1869_v42 = vpop.xlane.xlu1 %1868 }
 0xb6b   : > { %v1873_v27 = vmul.f32 0.03125, %v1869_v42 }
 0xb6c   : > { %v1872_v41 = vpop.xlane.xlu0 %1871 }
 0xb6d   : > { %v1875_v43 = vsub.f32 %v3275_v23, %v1873_v27  ;;  %v1874_v35 = vmul.f32 0.03125, %v1872_v41 }
 0xb6f   : > { %v1876_v44 = vsub.f32 %v3277_v32, %v1874_v35  ;;  %v1877_v46 = vmul.f32 %v1875_v43, %v1875_v43 }
 0xb71   : > { %v1879_v49 = vsel %vm697_vm1, %v1877_v46, 0.0  ;;  %v1878_v51 = vmul.f32 %v1876_v44, %v1876_v44 }
 0xb72   : > { %1880 = vadd.xlane.f32.xlu0 %v1879_v49 }
 0xb73   : > { %v1882_v52 = vsel %vm697_vm1, %v1878_v51, 0.0 }
 0xb76   : > { %1883 = vadd.xlane.f32.xlu0 %v1882_v52 }
 0xbff   : > { %v1881_v54 = vpop.xlane.xlu0 %1880 }
 0xc00   : > { %v1885_v55 = vmul.f32 0.03125, %v1881_v54 }
 0xc02   : > { %v1887_v56 = vadd.f32 1e-05, %v1885_v55 }
 0xc03   : > { %v1884_v45 = vpop.xlane.xlu0 %1883 }
 0xc04   : > { %2795 = vrsqrt.f32 %v1887_v56  ;;  %v1886_v57 = vmul.f32 0.03125, %v1884_v45  ;;  %vm1891_vm12 = vcmp.eq.f32.partialorder %v1887_v56, inf  ;;  %v1894_v61 = vand.u32 2147483648, %v1887_v56 }
 0xc05   : > { %vm1893_vm13 = vcmp.eq.f32.partialorder %v1887_v56, 0.0 }
 0xc06   : > { %v1888_v58 = vadd.f32 1e-05, %v1886_v57 }
 0xc08   : > { %2797 = vrsqrt.f32 %v1888_v58  ;;  %vm1898_vm14 = vcmp.eq.f32.partialorder %v1888_v58, inf  ;;  %v1901_v50 = vand.u32 2147483648, %v1888_v58  ;;  %vm1900_vm15 = vcmp.eq.f32.partialorder %v1888_v58, 0.0 }
 0xc0e   : > { %v2796_v40 = vpop.eup %2795 }
 0xc0f   : > { %v1890_v60 = vmul.f32 %v2796_v40, %v1887_v56 }
 0xc11   : > { %v1892_v48 = vsel %vm1891_vm12, %v1887_v56, %v1890_v60 }
 0xc12   : > { %v1895_v59 = vsel %vm1893_vm13, %v1894_v61, %v1892_v48  ;;  %v2798_v62 = vpop.eup %2797 }
 0xc13   : > { %2799 = vrcp.f32 %v1895_v59  ;;  %v1897_v63 = vmul.f32 %v2798_v62, %v1888_v58 }
 0xc15   : > { %v1899_v0 = vsel %vm1898_vm14, %v1888_v58, %v1897_v63 }
 0xc16   : > { %v1902_v47 = vsel %vm1900_vm15, %v1901_v50, %v1899_v0 }
 0xc17   : > { %2801 = vrcp.f32 %v1902_v47 }
 0xc1d   : > { %v2800_v1 = vpop.eup %2799 }
 0xc1e   : > { %v1904_v9 = vmul.f32 %v2800_v1, %v1875_v43 }
 0xc20   : > { %v1913_v4 = vmul.f32 %v2444_v2, %v1904_v9 }
 0xc21   : > { %v2802_v14 = vpop.eup %2801 }
 0xc22   : > { %v1906_v3 = vmul.f32 %v2802_v14, %v1876_v44  ;;  %v1921_v7 = vadd.f32 %v2445_v5, %v1913_v4 }
 0xc24   : > { %v1914_v6 = vmul.f32 %v2444_v2, %v1906_v3  ;;  %v2857_v2 = vmov (!%p2459_p6), 0.0  }
 0xc25   : > { %2662 = vmatprep.subr.bf16.mxu0 (!%p2459_p6), %v2857_v2 }
 0xc26   : > { %v1922_v8 = vadd.f32 %v2445_v5, %v1914_v6 }
 0xc28   : > { %v1923_v10 = vpack.c.bf16 %v1922_v8, %v1921_v7 }
 0xc2a   : > { %2639 = vmatmul.mubr.msk.bf16.vlgmr.msra.gmra.mrb[40].mxu0 %vm697_vm1, %v1923_v10 }
 0xc2b   : > { %2664 = vmatprep.mubr.msk.bf16.mxu0 (!%p2459_p6), %vm2858_vm0, %v2857_v2 }
 0xcfd   : > { %v1984_v22 = vpop.f32.mrb[40].mxu0 }
 0xcfe   : > { %v1985_v24 = vadd.f32 %v2446_v21, %v1984_v22  ;;  %v2640_v26 = vpop.f32.mrb[41].mxu0 }
 0xcff   : > { %v1987_v25 = vpop.f32.mrb[42].mxu0 }
 0xd00   : > { %v1993_v28 = vmul.f32 0.044715, %v1985_v24  ;;  %v1988_v29 = vadd.f32 %v2446_v21, %v1987_v25  ;;  %v2641_v30 = vpop.f32.mrb[43].mxu0  ;;  %v1991_v44 = vmul.f32 0.5, %v1985_v24 }
 0xd02   : > { %v1995_v31 = vmul.f32 %v1993_v28, %v1985_v24  ;;  %v1994_v34 = vmul.f32 0.044715, %v1988_v29  ;;  %v1992_v46 = vmul.f32 0.5, %v1988_v29 }
 0xd04   : > { %v1997_v37 = vmul.f32 %v1995_v31, %v1985_v24  ;;  %v1996_v36 = vmul.f32 %v1994_v34, %v1988_v29 }
 0xd06   : > { %v1999_v33 = vadd.f32 %v1997_v37, %v1985_v24  ;;  %v1998_v39 = vmul.f32 %v1996_v36, %v1988_v29  ;;  %v2460_v24 = vld [vmem:[%s3393_s27] ss:$0 sm:$0xff] (!%p2459_p6) }
 0xd08   : > { %v2001_v17 = vmul.f32 0.7978846, %v1999_v33  ;;  %v2000_v42 = vadd.f32 %v1998_v39, %v1988_v29  ;;  %v2461_v29 = vld [vmem:[%s3394_s28] ss:$0 sm:$0xff] (!%p2459_p6) }
 0xd09   : > { %v2188_v33 = vld [vmem:[%s3395_s16] sm:$0x1] (!%p2459_p6) }
 0xd0a   : > { %2803 = vtanh.f32 %v2001_v17  ;;  %v2002_v27 = vmul.f32 0.7978846, %v2000_v42 }
 0xd0c   : > { %2805 = vtanh.f32 %v2002_v27 }
 0xd14   : > { %v2804_v41 = vpop.eup %2803 }
 0xd15   : > { %v2005_v43 = vadd.f32 1.0, %v2804_v41 }
 0xd16   : > { %v2806_v35 = vpop.eup %2805 }
 0xd17   : > { %v2006_v49 = vadd.f32 1.0, %v2806_v35  ;;  %v2007_v51 = vmul.f32 %v2005_v43, %v1991_v44 }
 0xd19   : > { %v2008_v52 = vmul.f32 %v2006_v49, %v1992_v46 }
 0xd1b   : > { %v2009_v53 = vpack.c.bf16 %v2008_v52, %v2007_v51 }
 0xd1d   : > { %2659 = vmatmul.mubr.bf16.vlgmr.msra.gmra.mrb[32].mxu1 %v2009_v53 }
 0xdf0   : > { %v2115_v54 = vpop.f32.mrb[32].mxu1 }
 0xdf1   : > { %v2116_v55 = vadd.f32 %v2450_v38, %v2115_v54  ;;  %v2660_v56 = vpop.f32.mrb[33].mxu1  ;;  %2129 = sbr.rel (%p2459_p6) target bundleno = 4130 (0x1022), region = 88 }
 0xdf2   : > { %v2118_v45 = vpop.f32.mrb[34].mxu1 }
 0xdf3   : > { %v2122_v57 = vadd.f32 %v2116_v55, %v3275_v23  ;;  %v2119_v58 = vadd.f32 %v2450_v38, %v2118_v45  ;;  %v2661_v40 = vpop.f32.mrb[35].mxu1 }
 0xdf5   : > { %2124 = vst.msk [vmem:[#allocation2] sm:$0xff] %vm697_vm1, %v2122_v57  ;;  %v2123_v60 = vadd.f32 %v2119_v58, %v3277_v32  ;;  %v2132_v61 = vsel (!%p2459_p6), %vm697_vm1, %v2122_v57, 0.0 }
 0xdf6   : > { %2133 = vadd.xlane.f32.xlu0 (!%p2459_p6), %v2132_v61 }
 0xdf7   : > { %2125 = vst.msk [vmem:[#allocation2 + $0x8] sm:$0xff] %vm697_vm1, %v2123_v60  ;;  %v2135_v48 = vsel (!%p2459_p6), %vm697_vm1, %v2123_v60, 0.0 }
 0xdfa   : > { %2136 = vadd.xlane.f32.xlu0 %v2135_v48 }
 0xe83   : > { %v2134_v59 = vpop.xlane.xlu0 %2133 }
 0xe84   : > { %v2138_v62 = vmul.f32 0.03125, %v2134_v59 }
 0xe86   : > { %v2140_v23 = vsub.f32 %v2122_v57, %v2138_v62 }
 0xe87   : > { %v2137_v63 = vpop.xlane.xlu0 %2136 }
 0xe88   : > { %v2139_v50 = vmul.f32 0.03125, %v2137_v63  ;;  %v2142_v0 = vmul.f32 %v2140_v23, %v2140_v23 }
 0xe8a   : > { %v2141_v47 = vsub.f32 %v2123_v60, %v2139_v50  ;;  %v2144_v32 = vsel %vm697_vm1, %v2142_v0, 0.0 }
 0xe8b   : > { %2145 = vadd.xlane.f32.xlu1 %v2144_v32 }
 0xe8c   : > { %v2143_v1 = vmul.f32 %v2141_v47, %v2141_v47 }
 0xe8e   : > { %v2147_v9 = vsel %vm697_vm1, %v2143_v1, 0.0 }
 0xe8f   : > { %2148 = vadd.xlane.f32.xlu1 %v2147_v9 }
 0xf18   : > { %v2146_v14 = vpop.xlane.xlu1 %2145 }
 0xf19   : > { %v2150_v3 = vmul.f32 0.03125, %v2146_v14 }
 0xf1b   : > { %v2152_v4 = vadd.f32 1e-05, %v2150_v3 }
 0xf1c   : > { %v2149_v5 = vpop.xlane.xlu1 %2148 }
 0xf1d   : > { %2809 = vrsqrt.f32 %v2152_v4  ;;  %v2151_v6 = vmul.f32 0.03125, %v2149_v5  ;;  %vm2156_vm2 = vcmp.eq.f32.partialorder %v2152_v4, inf  ;;  %v2159_v11 = vand.u32 2147483648, %v2152_v4 }
 0xf1e   : > { %vm2158_vm3 = vcmp.eq.f32.partialorder %v2152_v4, 0.0 }
 0xf1f   : > { %v2153_v7 = vadd.f32 1e-05, %v2151_v6 }
 0xf21   : > { %2811 = vrsqrt.f32 %v2153_v7  ;;  %vm2163_vm4 = vcmp.eq.f32.partialorder %v2153_v7, inf  ;;  %v2166_v18 = vand.u32 2147483648, %v2153_v7  ;;  %vm2165_vm5 = vcmp.eq.f32.partialorder %v2153_v7, 0.0 }
 0xf27   : > { %v2810_v8 = vpop.eup %2809 }
 0xf28   : > { %v2155_v10 = vmul.f32 %v2810_v8, %v2152_v4 }
 0xf2a   : > { %v2157_v12 = vsel %vm2156_vm2, %v2152_v4, %v2155_v10 }
 0xf2b   : > { %v2160_v13 = vsel %vm2158_vm3, %v2159_v11, %v2157_v12  ;;  %v2812_v15 = vpop.eup %2811 }
 0xf2c   : > { %2813 = vrcp.f32 %v2160_v13  ;;  %v2162_v16 = vmul.f32 %v2812_v15, %v2153_v7 }
 0xf2e   : > { %v2164_v20 = vsel %vm2163_vm4, %v2153_v7, %v2162_v16 }
 0xf2f   : > { %v2167_v19 = vsel %vm2165_vm5, %v2166_v18, %v2164_v20 }
 0xf30   : > { %2815 = vrcp.f32 %v2167_v19 }
 0xf36   : > { %v2814_v21 = vpop.eup %2813 }
 0xf37   : > { %v2169_v22 = vmul.f32 %v2814_v21, %v2140_v23 }
 0xf39   : > { %v2178_v28 = vmul.f32 %v2460_v24, %v2169_v22 }
 0xf3a   : > { %v2816_v26 = vpop.eup %2815 }
 0xf3b   : > { %v2171_v25 = vmul.f32 %v2816_v26, %v2141_v47  ;;  %v2186_v31 = vadd.f32 %v2461_v29, %v2178_v28 }
 0xf3d   : > { %v2179_v30 = vmul.f32 %v2460_v24, %v2171_v25 }
 0xf3f   : > { %v2187_v34 = vadd.f32 %v2461_v29, %v2179_v30 }
 0xf41   : > { %v2189_v37 = vpack.c.bf16 %v2187_v34, %v2186_v31 }
 0xf43   : > { %v2194_v36 = vsel %vm697_vm1, %v2189_v37, 0 }
 0xf44   : > { %2663 = vmatpush3.bf16.xpose.msra.mxu0 %v2194_v36 }
 0xf4b   : > { %2665 = vmatmul.mubr.msk.bf16.vlgmr.msra.gmra.mrb[0].mxu0 %vm697_vm1, %v2188_v33 }
0x101e   : > { %v2230_v39 = vpop.f32.mrb[0].mxu0 }
0x101f   : > { %2237 = vst.msk [vmem:[%s3396_s19] sm:$0x1] %vm2236_vm6, %v2230_v39  ;;  %v2666_v17 = vpop.f32.mrb[1].mxu0 }
0x1020   : > { %v2233_v42 = vpop.f32.mrb[2].mxu0 }
0x1021   : > { %v2667_v27 = vpop.f32.mrb[3].mxu0 }
0x1022 PF: > { %s3397_s4 = sld [smem:[#allocation4_spill]]  ;;  %s3398_s18 = sld [smem:[#allocation3_spill]] }
0x1023   : > { %s3399_s19 = sld [smem:[#allocation5_spill]] }
0x1028   : > { %s25_s20 = sadd.s32 1, %s3397_s4  }
0x1029   : > { %p22_p7 = scmp.ge.s32.totalorder %s25_s20, 4  }
0x102b   :  { %24 = sbr.rel (!%p22_p7) target bundleno = 8 (0x8), region = 151 }

</bundles_post_ra>
